<compile_context>
chip_gen: v5e
topology: v5e:2x2
jax: 0.10.0
libtpu: 0.0.40
codegen_flags: <defaults>
</compile_context>

<pallas_src>
import functools

import jax
import jax.numpy as jnp
from jax import lax
from jax.scipy.linalg import block_diag
from jax.experimental import pallas as pl
from jax.experimental.pallas import tpu as pltpu

LN_EPS = 1e-5


def _masknet_kernel(num_blocks, num_mlp_layers, *refs):
    # refs layout:
    #   x_ref                                      (TB, D)        bf16
    #   w1, b1, w2, b2, wh, pnorm, gamma, beta     fused params
    #   (wm_l, bm_l) * num_mlp_layers
    #   wo, bo
    #   out_ref                                    (1, TB)        f32  (lane-dense row)
    x_ref = refs[0]
    (w1_ref, b1_ref, w2_ref, b2_ref, wh_ref,
     p_ref, g_ref, be_ref) = refs[1:9]
    mlp_refs = refs[9:9 + 2 * num_mlp_layers]
    wo_ref, bo_ref = refs[9 + 2 * num_mlp_layers: 11 + 2 * num_mlp_layers]
    out_ref = refs[11 + 2 * num_mlp_layers]

    x_bf = x_ref[...]                                  # (TB, D) bf16 (MXU + mask operand)

    # Stage 1: all mask first-layers in one wide matmul: (TB, D) @ (D, N*Dr)
    h1 = jnp.dot(x_bf, w1_ref[...], preferred_element_type=jnp.float32) + b1_ref[...]
    h1 = jnp.maximum(h1, 0.0)

    # Stage 2: block-diagonal second mask Linear: (TB, N*Dr) @ (N*Dr, N*D)
    v_mask = jnp.dot(h1.astype(jnp.bfloat16), w2_ref[...],
                     preferred_element_type=jnp.float32) + b2_ref[...]

    # Elementwise mask in bf16 (bf16 VALU on v6e/v7x, halves vreg pressure on the
    # widest (TB, N*D) intermediate; still correct everywhere).
    x_rep = jnp.concatenate([x_bf] * num_blocks, axis=-1)        # (TB, N*D) bf16
    masked = v_mask.astype(jnp.bfloat16) * x_rep                 # (TB, N*D) bf16

    # Stage 3: block-diagonal hidden Linear (no bias): (TB, N*D) @ (N*D, N*BD)
    z = jnp.dot(masked, wh_ref[...], preferred_element_type=jnp.float32)   # (TB, N*BD) f32

    # Per-block LayerNorm via bf16 block-averaging matrix P:
    #   P[i, j] = 1/block_dim if i and j are in the same block else 0,
    # so z @ P is each block's mean broadcast back over its own lanes.
    # No reshapes, lane-dense, reductions ride the otherwise idle MXU; explicit
    # bf16 operands with f32 accumulation (no DEFAULT-precision ambiguity).
    p = p_ref[...]                                                          # bf16
    mu = jnp.dot(z.astype(jnp.bfloat16), p, preferred_element_type=jnp.float32)
    c = z - mu
    var = jnp.dot((c * c).astype(jnp.bfloat16), p,
                  preferred_element_type=jnp.float32)                       # biased variance
    zn = c * lax.rsqrt(var + LN_EPS)
    h = jnp.maximum(zn * g_ref[...] + be_ref[...], 0.0)                     # (TB, N*BD) f32

    # MLP hidden layers: Linear -> ReLU (Dropout = identity in eval mode).
    for l in range(num_mlp_layers):
        wm = mlp_refs[2 * l][...]
        bm = mlp_refs[2 * l + 1][...]
        h = jnp.maximum(
            jnp.dot(h.astype(jnp.bfloat16), wm, preferred_element_type=jnp.float32) + bm,
            0.0)

    # Output Linear(hidden, 1) emitted lane-dense: (1, H) @ (H, TB) -> (1, TB).
    # Transposed-RHS dot is the same well-trodden pattern as q @ k.T; result row is
    # written with unmasked, contiguous stores (no 1-lane masked column).
    out_ref[...] = (jnp.dot(wo_ref[...], h.astype(jnp.bfloat16).T,
                            preferred_element_type=jnp.float32) + bo_ref[...])


def _pick_batch_tile(batch, cap=2048):
    """Largest 128-multiple power-of-two tile <= cap dividing `batch`, preferring an
    EVEN grid >= 2 (so v7x's two TensorCores both get work and the pipeline overlaps)."""
    pow2 = [t for t in (128, 256, 512, 1024, 2048, 4096) if t <= cap]
    for t in reversed(pow2):
        if batch % t == 0 and (batch // t) >= 2 and (batch // t) % 2 == 0:
            return t
    for t in reversed(pow2):
        if batch % t == 0:
            return t
    return batch  # tiny / awkward batch: single full-batch tile


def _vmem_cap_bytes():
    """Generation-aware VMEM ceiling: ~3/4 of physical, capped at 96 MiB.
    -> ~96 MiB on v5e/v6e (128 MiB parts), ~48 MiB on v7x (64 MiB part)."""
    phys = 64 << 20  # conservative default (v7x physical)
    try:
        info = pltpu.get_tpu_info()
        for attr in ("vmem_capacity_bytes", "vmem_bytes", "vmem_size_bytes"):
            v = getattr(info, attr, None)
            if v:
                phys = int(v)
                break
    except Exception:
        pass
    return min((phys * 3) // 4, 96 << 20)


def parallel_masknet_forward(x, fused, *, batch_tile=None):
    """x: (B, D) float32.  fused: dict from fuse_params().  Returns (B, 1) float32."""
    B, D = x.shape
    num_blocks = fused["num_blocks"]
    num_mlp_layers = len(fused["mlp_w"])

    if batch_tile is None:
        batch_tile = _pick_batch_tile(B)
    assert B % batch_tile == 0, (B, batch_tile)

    # bf16 activations halve input DMA bytes; accumulation stays f32 in-kernel.
    x_bf = x.astype(jnp.bfloat16)

    flat_args = [
        x_bf,
        fused["w1"], fused["b1"], fused["w2"], fused["b2"], fused["wh"],
        fused["pnorm"], fused["gamma"], fused["beta"],
    ]
    for w, b in zip(fused["mlp_w"], fused["mlp_b"]):
        flat_args += [w, b]
    flat_args += [fused["out_w"], fused["out_b"]]

    def param_spec(a):
        # Whole (small) parameter tensor with a constant index map: the pipeline
        # re-uses the same block every grid step, so it is DMA'd only once.
        # (pl.Buffered(1) skipped: total params < 0.5 MiB, double-buffering is free.)
        return pl.BlockSpec(a.shape, lambda b, nd=a.ndim: (0,) * nd)

    in_specs = [pl.BlockSpec((batch_tile, D), lambda b: (b, 0))]
    in_specs += [param_spec(a) for a in flat_args[1:]]
    # Lane-dense output: one (1, B) row, each grid step writes a (1, batch_tile) slab.
    out_specs = pl.BlockSpec((1, batch_tile), lambda b: (0, b))

    # Explicit VMEM budget: double-buffered input/output tiles, parameters (x2 for
    # default double-buffering), generous headroom for f32 intermediates; clamped to
    # the generation-aware ceiling so large batch tiles are allowed on 128 MiB parts
    # while staying safe on v7x's 64 MiB.
    def nbytes(a):
        return a.size * a.dtype.itemsize

    widest = max(a.shape[-1] for a in flat_args[1:])
    tile_bytes = 2 * (batch_tile * D * 2) + 2 * (batch_tile * 4)
    param_bytes = 2 * sum(nbytes(a) for a in flat_args[1:])
    interm_bytes = 10 * batch_tile * widest * 4
    vmem_limit = int(tile_bytes + param_bytes + interm_bytes + (4 << 20))
    vmem_limit = min(max(vmem_limit, 16 << 20), _vmem_cap_bytes())

    kernel = functools.partial(_masknet_kernel, num_blocks, num_mlp_layers)

    out_row = pl.pallas_call(
        kernel,
        out_shape=jax.ShapeDtypeStruct((1, B), jnp.float32),
        grid_spec=pltpu.PrefetchScalarGridSpec(
            num_scalar_prefetch=0,
            grid=(B // batch_tile,),          # even grid >= 2 when possible
            in_specs=in_specs,
            out_specs=out_specs,
        ),
        compiler_params=pltpu.CompilerParams(
            dimension_semantics=("parallel",),  # batch tiles shard across TCs on v7x
            vmem_limit_bytes=vmem_limit,
        ),
    )(*flat_args)

    return out_row.reshape(B, 1)


def init_params(key, input_dim, num_blocks, block_dim, mlp_layers, reduction_ratio=1):
    """Deterministic synthetic per-block parameters (weights stored as (in, out))."""
    D, r = input_dim, reduction_ratio
    ks = iter(jax.random.split(key, 64))
    scale = 0.1

    def w(k, shape):
        return (scale * jax.random.normal(k, shape)).astype(jnp.float32)

    params = {
        # mask_layer: Linear(D, D*r) -> ReLU -> Linear(D*r, D)   (stacked over blocks)
        "w1": w(next(ks), (num_blocks, D, D * r)),
        "b1": w(next(ks), (num_blocks, 1, D * r)),
        "w2": w(next(ks), (num_blocks, D * r, D)),
        "b2": w(next(ks), (num_blocks, 1, D)),
        # hidden_layer: Linear(D, block_dim, bias=False) + LayerNorm(block_dim)
        "wh": w(next(ks), (num_blocks, D, block_dim)),
        "gamma": jnp.ones((num_blocks, 1, block_dim), jnp.float32),
        "beta": jnp.zeros((num_blocks, 1, block_dim), jnp.float32),
        "mlp_w": [],
        "mlp_b": [],
    }
    in_dim = num_blocks * block_dim
    for h in mlp_layers:
        params["mlp_w"].append(w(next(ks), (in_dim, h)))
        params["mlp_b"].append(w(next(ks), (1, h)))
        in_dim = h
    params["out_w"] = w(next(ks), (in_dim, 1))
    params["out_b"] = jnp.zeros((1, 1), jnp.float32)
    return params


def fuse_params(params, *, mxu_dtype=jnp.bfloat16):
    """Fuse per-block weights into wide / block-diagonal matrices for lane-dense MXU ops."""
    w1, b1 = params["w1"], params["b1"]      # (N, D, Dr), (N, 1, Dr)
    w2, b2 = params["w2"], params["b2"]      # (N, Dr, D), (N, 1, D)
    wh = params["wh"]                        # (N, D, BD)
    gamma, beta = params["gamma"], params["beta"]
    N, D, Dr = w1.shape
    BD = wh.shape[-1]

    w1_cat = jnp.concatenate([w1[i] for i in range(N)], axis=1)        # (D, N*Dr)
    b1_cat = jnp.concatenate([b1[i] for i in range(N)], axis=1)        # (1, N*Dr)
    w2_bd = block_diag(*[w2[i] for i in range(N)])                     # (N*Dr, N*D)
    b2_cat = jnp.concatenate([b2[i] for i in range(N)], axis=1)        # (1, N*D)
    wh_bd = block_diag(*[wh[i] for i in range(N)])                     # (N*D, N*BD)
    gamma_cat = jnp.concatenate([gamma[i] for i in range(N)], axis=1)  # (1, N*BD)
    beta_cat = jnp.concatenate([beta[i] for i in range(N)], axis=1)    # (1, N*BD)
    pnorm = block_diag(*([jnp.full((BD, BD), 1.0 / BD, jnp.float32)] * N))  # (N*BD, N*BD)

    return {
        "num_blocks": N,
        "w1": w1_cat.astype(mxu_dtype),
        "b1": b1_cat.astype(jnp.float32),
        "w2": w2_bd.astype(mxu_dtype),
        "b2": b2_cat.astype(jnp.float32),
        "wh": wh_bd.astype(mxu_dtype),
        "pnorm": pnorm.astype(mxu_dtype),                  # bf16 P (explicit MXU dtype)
        "gamma": gamma_cat.astype(jnp.float32),
        "beta": beta_cat.astype(jnp.float32),
        "mlp_w": [w.astype(mxu_dtype) for w in params["mlp_w"]],
        "mlp_b": [b.astype(jnp.float32) for b in params["mlp_b"]],
        "out_w": params["out_w"].T.astype(mxu_dtype),      # (1, hidden) bf16 row for MXU dot
        "out_b": params["out_b"].astype(jnp.float32),
    }


def reference_forward(x, params):
    """Pure-JAX f32 reference (per-block, unfused) for correctness check."""
    num_blocks = params["w1"].shape[0]
    outs = []
    for i in range(num_blocks):
        h1 = jnp.maximum(x @ params["w1"][i] + params["b1"][i], 0.0)
        v_mask = h1 @ params["w2"][i] + params["b2"][i]
        z = (v_mask * x) @ params["wh"][i]
        mu = jnp.mean(z, -1, keepdims=True)
        var = jnp.mean((z - mu) ** 2, -1, keepdims=True)
        zn = (z - mu) / jnp.sqrt(var + LN_EPS)
        outs.append(jnp.maximum(zn * params["gamma"][i] + params["beta"][i], 0.0))
    h = jnp.concatenate(outs, -1)
    for wm, bm in zip(params["mlp_w"], params["mlp_b"]):
        h = jnp.maximum(h @ wm + bm, 0.0)
    return h @ params["out_w"] + params["out_b"]


if __name__ == "__main__":
    # Small, lane-friendly shapes consistent with the module's forward:
    # 8 fields x 8-dim embeddings -> flattened input_dim=64; 2 blocks of 64 -> concat=128.
    batch = 512
    num_fields, embed_dim = 8, 8
    input_dim = num_fields * embed_dim
    num_blocks = 2
    block_dim = 64
    mlp_layers = [128, 128]

    key = jax.random.PRNGKey(0)
    kx, kp = jax.random.split(key)
    x = jax.random.normal(kx, (batch, input_dim), dtype=jnp.float32)
    params = init_params(kp, input_dim, num_blocks, block_dim, mlp_layers)
    fused = fuse_params(params)

    # No hard-coded tile: picker chooses 256 here -> grid=(2,), even, pipelined.
    out = parallel_masknet_forward(x, fused)
    out = jax.block_until_ready(out)

    ref = reference_forward(x, params)
    assert out.shape == (batch, 1)
    # bf16 MXU operands with f32 accumulation -> relaxed tolerance vs the pure-f32 reference.
    err = jnp.max(jnp.abs(out - ref))
    scale = jnp.max(jnp.abs(ref)) + 1e-6
    assert err / scale < 5e-2, (err, scale)
    print("KERNEL_OK")
</pallas_src>

<mosaic_0001>
module attributes {stable_mosaic.version = 11 : i64} {
  func.func @_masknet_kernel(%arg0: i32, %arg1: memref<256x64xbf16, #tpu.memory_space<vmem>>, %arg2: memref<64x128xbf16, #tpu.memory_space<vmem>>, %arg3: memref<1x128xf32, #tpu.memory_space<vmem>>, %arg4: memref<128x128xbf16, #tpu.memory_space<vmem>>, %arg5: memref<1x128xf32, #tpu.memory_space<vmem>>, %arg6: memref<128x128xbf16, #tpu.memory_space<vmem>>, %arg7: memref<128x128xbf16, #tpu.memory_space<vmem>>, %arg8: memref<1x128xf32, #tpu.memory_space<vmem>>, %arg9: memref<1x128xf32, #tpu.memory_space<vmem>>, %arg10: memref<128x128xbf16, #tpu.memory_space<vmem>>, %arg11: memref<1x128xf32, #tpu.memory_space<vmem>>, %arg12: memref<128x128xbf16, #tpu.memory_space<vmem>>, %arg13: memref<1x128xf32, #tpu.memory_space<vmem>>, %arg14: memref<1x128xbf16, #tpu.memory_space<vmem>>, %arg15: memref<1x1xf32, #tpu.memory_space<vmem>>, %arg16: memref<1x256xf32, #tpu.memory_space<vmem>>) attributes {dimension_semantics = [#tpu.dimension_semantics<parallel>], iteration_bounds = array<i64: 2>, scalar_prefetch = 0 : i64, scratch_operands = 0 : i64, tpu.core_type = #tpu.core_type<tc>, window_params = [{transform_indices = @transform_0, window_bounds = array<i64: 256, 64>}, {pipeline_mode = #tpu.pipeline_mode<synchronous>, transform_indices = @transform_1, window_bounds = array<i64: 64, 128>}, {pipeline_mode = #tpu.pipeline_mode<synchronous>, transform_indices = @transform_2, window_bounds = array<i64: 1, 128>}, {pipeline_mode = #tpu.pipeline_mode<synchronous>, transform_indices = @transform_3, window_bounds = array<i64: 128, 128>}, {pipeline_mode = #tpu.pipeline_mode<synchronous>, transform_indices = @transform_4, window_bounds = array<i64: 1, 128>}, {pipeline_mode = #tpu.pipeline_mode<synchronous>, transform_indices = @transform_5, window_bounds = array<i64: 128, 128>}, {pipeline_mode = #tpu.pipeline_mode<synchronous>, transform_indices = @transform_6, window_bounds = array<i64: 128, 128>}, {pipeline_mode = #tpu.pipeline_mode<synchronous>, transform_indices = @transform_7, window_bounds = array<i64: 1, 128>}, {pipeline_mode = #tpu.pipeline_mode<synchronous>, transform_indices = @transform_8, window_bounds = array<i64: 1, 128>}, {pipeline_mode = #tpu.pipeline_mode<synchronous>, transform_indices = @transform_9, window_bounds = array<i64: 128, 128>}, {pipeline_mode = #tpu.pipeline_mode<synchronous>, transform_indices = @transform_10, window_bounds = array<i64: 1, 128>}, {pipeline_mode = #tpu.pipeline_mode<synchronous>, transform_indices = @transform_11, window_bounds = array<i64: 128, 128>}, {pipeline_mode = #tpu.pipeline_mode<synchronous>, transform_indices = @transform_12, window_bounds = array<i64: 1, 128>}, {pipeline_mode = #tpu.pipeline_mode<synchronous>, transform_indices = @transform_13, window_bounds = array<i64: 1, 128>}, {pipeline_mode = #tpu.pipeline_mode<synchronous>, transform_indices = @transform_14, window_bounds = array<i64: 1, 1>}, {transform_indices = @transform_15, window_bounds = array<i64: 1, 256>}]} {
    %c0 = arith.constant 0 : index
    %c0_0 = arith.constant 0 : index
    %0 = vector.load %arg1[%c0, %c0_0] : memref<256x64xbf16, #tpu.memory_space<vmem>>, vector<256x64xbf16>
    %c0_1 = arith.constant 0 : index
    %c0_2 = arith.constant 0 : index
    %1 = vector.load %arg2[%c0_1, %c0_2] : memref<64x128xbf16, #tpu.memory_space<vmem>>, vector<64x128xbf16>
    %cst = arith.constant dense<0.000000e+00> : vector<256x128xf32>
    %2 = tpu.matmul %0, %1, %cst {dimension_numbers = #tpu.dot_dimension_numbers<[1], [0], [0], [1], [0, 0, 1, 1], [], []>} : vector<256x64xbf16>, vector<64x128xbf16>, vector<256x128xf32> -> vector<256x128xf32>
    %c0_3 = arith.constant 0 : index
    %c0_4 = arith.constant 0 : index
    %3 = vector.load %arg3[%c0_3, %c0_4] : memref<1x128xf32, #tpu.memory_space<vmem>>, vector<1x128xf32>
    %4 = vector.broadcast %3 : vector<1x128xf32> to vector<256x128xf32>
    %5 = arith.addf %2, %4 : vector<256x128xf32>
    %cst_5 = arith.constant 0.000000e+00 : f32
    %6 = vector.broadcast %cst_5 : f32 to vector<256x128xf32>
    %7 = arith.maximumf %5, %6 : vector<256x128xf32>
    %8 = arith.truncf %7 : vector<256x128xf32> to vector<256x128xbf16>
    %c0_6 = arith.constant 0 : index
    %c0_7 = arith.constant 0 : index
    %9 = vector.load %arg4[%c0_6, %c0_7] : memref<128x128xbf16, #tpu.memory_space<vmem>>, vector<128x128xbf16>
    %cst_8 = arith.constant dense<0.000000e+00> : vector<256x128xf32>
    %10 = tpu.matmul %8, %9, %cst_8 {dimension_numbers = #tpu.dot_dimension_numbers<[1], [0], [0], [1], [0, 0, 1, 1], [], []>} : vector<256x128xbf16>, vector<128x128xbf16>, vector<256x128xf32> -> vector<256x128xf32>
    %c0_9 = arith.constant 0 : index
    %c0_10 = arith.constant 0 : index
    %11 = vector.load %arg5[%c0_9, %c0_10] : memref<1x128xf32, #tpu.memory_space<vmem>>, vector<1x128xf32>
    %12 = vector.broadcast %11 : vector<1x128xf32> to vector<256x128xf32>
    %13 = arith.addf %10, %12 : vector<256x128xf32>
    %14 = tpu.concatenate %0, %0 in 1 : vector<256x64xbf16>, vector<256x64xbf16> -> vector<256x128xbf16>
    %15 = arith.truncf %13 : vector<256x128xf32> to vector<256x128xbf16>
    %16 = arith.mulf %15, %14 : vector<256x128xbf16>
    %c0_11 = arith.constant 0 : index
    %c0_12 = arith.constant 0 : index
    %17 = vector.load %arg6[%c0_11, %c0_12] : memref<128x128xbf16, #tpu.memory_space<vmem>>, vector<128x128xbf16>
    %cst_13 = arith.constant dense<0.000000e+00> : vector<256x128xf32>
    %18 = tpu.matmul %16, %17, %cst_13 {dimension_numbers = #tpu.dot_dimension_numbers<[1], [0], [0], [1], [0, 0, 1, 1], [], []>} : vector<256x128xbf16>, vector<128x128xbf16>, vector<256x128xf32> -> vector<256x128xf32>
    %c0_14 = arith.constant 0 : index
    %c0_15 = arith.constant 0 : index
    %19 = vector.load %arg7[%c0_14, %c0_15] : memref<128x128xbf16, #tpu.memory_space<vmem>>, vector<128x128xbf16>
    %20 = arith.truncf %18 : vector<256x128xf32> to vector<256x128xbf16>
    %cst_16 = arith.constant dense<0.000000e+00> : vector<256x128xf32>
    %21 = tpu.matmul %20, %19, %cst_16 {dimension_numbers = #tpu.dot_dimension_numbers<[1], [0], [0], [1], [0, 0, 1, 1], [], []>} : vector<256x128xbf16>, vector<128x128xbf16>, vector<256x128xf32> -> vector<256x128xf32>
    %22 = arith.subf %18, %21 : vector<256x128xf32>
    %23 = arith.mulf %22, %22 : vector<256x128xf32>
    %24 = arith.truncf %23 : vector<256x128xf32> to vector<256x128xbf16>
    %cst_17 = arith.constant dense<0.000000e+00> : vector<256x128xf32>
    %25 = tpu.matmul %24, %19, %cst_17 {dimension_numbers = #tpu.dot_dimension_numbers<[1], [0], [0], [1], [0, 0, 1, 1], [], []>} : vector<256x128xbf16>, vector<128x128xbf16>, vector<256x128xf32> -> vector<256x128xf32>
    %cst_18 = arith.constant 9.99999974E-6 : f32
    %26 = vector.broadcast %cst_18 : f32 to vector<256x128xf32>
    %27 = arith.addf %25, %26 : vector<256x128xf32>
    %28 = math.rsqrt %27 : vector<256x128xf32>
    %29 = arith.mulf %22, %28 : vector<256x128xf32>
    %c0_19 = arith.constant 0 : index
    %c0_20 = arith.constant 0 : index
    %30 = vector.load %arg8[%c0_19, %c0_20] : memref<1x128xf32, #tpu.memory_space<vmem>>, vector<1x128xf32>
    %31 = vector.broadcast %30 : vector<1x128xf32> to vector<256x128xf32>
    %32 = arith.mulf %29, %31 : vector<256x128xf32>
    %c0_21 = arith.constant 0 : index
    %c0_22 = arith.constant 0 : index
    %33 = vector.load %arg9[%c0_21, %c0_22] : memref<1x128xf32, #tpu.memory_space<vmem>>, vector<1x128xf32>
    %34 = vector.broadcast %33 : vector<1x128xf32> to vector<256x128xf32>
    %35 = arith.addf %32, %34 : vector<256x128xf32>
    %cst_23 = arith.constant 0.000000e+00 : f32
    %36 = vector.broadcast %cst_23 : f32 to vector<256x128xf32>
    %37 = arith.maximumf %35, %36 : vector<256x128xf32>
    %c0_24 = arith.constant 0 : index
    %c0_25 = arith.constant 0 : index
    %38 = vector.load %arg10[%c0_24, %c0_25] : memref<128x128xbf16, #tpu.memory_space<vmem>>, vector<128x128xbf16>
    %c0_26 = arith.constant 0 : index
    %c0_27 = arith.constant 0 : index
    %39 = vector.load %arg11[%c0_26, %c0_27] : memref<1x128xf32, #tpu.memory_space<vmem>>, vector<1x128xf32>
    %40 = arith.truncf %37 : vector<256x128xf32> to vector<256x128xbf16>
    %cst_28 = arith.constant dense<0.000000e+00> : vector<256x128xf32>
    %41 = tpu.matmul %40, %38, %cst_28 {dimension_numbers = #tpu.dot_dimension_numbers<[1], [0], [0], [1], [0, 0, 1, 1], [], []>} : vector<256x128xbf16>, vector<128x128xbf16>, vector<256x128xf32> -> vector<256x128xf32>
    %42 = vector.broadcast %39 : vector<1x128xf32> to vector<256x128xf32>
    %43 = arith.addf %41, %42 : vector<256x128xf32>
    %cst_29 = arith.constant 0.000000e+00 : f32
    %44 = vector.broadcast %cst_29 : f32 to vector<256x128xf32>
    %45 = arith.maximumf %43, %44 : vector<256x128xf32>
    %c0_30 = arith.constant 0 : index
    %c0_31 = arith.constant 0 : index
    %46 = vector.load %arg12[%c0_30, %c0_31] : memref<128x128xbf16, #tpu.memory_space<vmem>>, vector<128x128xbf16>
    %c0_32 = arith.constant 0 : index
    %c0_33 = arith.constant 0 : index
    %47 = vector.load %arg13[%c0_32, %c0_33] : memref<1x128xf32, #tpu.memory_space<vmem>>, vector<1x128xf32>
    %48 = arith.truncf %45 : vector<256x128xf32> to vector<256x128xbf16>
    %cst_34 = arith.constant dense<0.000000e+00> : vector<256x128xf32>
    %49 = tpu.matmul %48, %46, %cst_34 {dimension_numbers = #tpu.dot_dimension_numbers<[1], [0], [0], [1], [0, 0, 1, 1], [], []>} : vector<256x128xbf16>, vector<128x128xbf16>, vector<256x128xf32> -> vector<256x128xf32>
    %50 = vector.broadcast %47 : vector<1x128xf32> to vector<256x128xf32>
    %51 = arith.addf %49, %50 : vector<256x128xf32>
    %cst_35 = arith.constant 0.000000e+00 : f32
    %52 = vector.broadcast %cst_35 : f32 to vector<256x128xf32>
    %53 = arith.maximumf %51, %52 : vector<256x128xf32>
    %c0_36 = arith.constant 0 : index
    %c0_37 = arith.constant 0 : index
    %54 = vector.load %arg14[%c0_36, %c0_37] : memref<1x128xbf16, #tpu.memory_space<vmem>>, vector<1x128xbf16>
    %55 = arith.truncf %53 : vector<256x128xf32> to vector<256x128xbf16>
    %56 = tpu.transpose %55, [1, 0] : vector<256x128xbf16> -> vector<128x256xbf16>
    %cst_38 = arith.constant dense<0.000000e+00> : vector<1x256xf32>
    %57 = tpu.matmul %54, %56, %cst_38 {dimension_numbers = #tpu.dot_dimension_numbers<[1], [0], [0], [1], [0, 0, 1, 1], [], []>} : vector<1x128xbf16>, vector<128x256xbf16>, vector<1x256xf32> -> vector<1x256xf32>
    %c0_39 = arith.constant 0 : index
    %c0_40 = arith.constant 0 : index
    %58 = vector.load %arg15[%c0_39, %c0_40] : memref<1x1xf32, #tpu.memory_space<vmem>>, vector<1x1xf32>
    %59 = vector.broadcast %58 : vector<1x1xf32> to vector<1x256xf32>
    %60 = arith.addf %57, %59 : vector<1x256xf32>
    %c0_41 = arith.constant 0 : index
    %c0_42 = arith.constant 0 : index
    %61 = vector.load %arg16[%c0_41, %c0_42] : memref<1x256xf32, #tpu.memory_space<vmem>>, vector<1x256xf32>
    tpu.vector_store %arg16[%c0_41, %c0_42], %60 {strides = array<i32>} : memref<1x256xf32, #tpu.memory_space<vmem>>, vector<1x256xf32>,
    return
  }
  func.func @transform_0(%arg0: i32) -> (i32, i32) {
    %c0_i32 = arith.constant 0 : i32
    %c0_i32_0 = arith.constant 0 : i32
    return %arg0, %c0_i32 : i32, i32
  }
  func.func @transform_1(%arg0: i32) -> (i32, i32) {
    %c0_i32 = arith.constant 0 : i32
    %c0_i32_0 = arith.constant 0 : i32
    %c0_i32_1 = arith.constant 0 : i32
    return %c0_i32, %c0_i32_0 : i32, i32
  }
  func.func @transform_2(%arg0: i32) -> (i32, i32) {
    %c0_i32 = arith.constant 0 : i32
    %c0_i32_0 = arith.constant 0 : i32
    %c0_i32_1 = arith.constant 0 : i32
    return %c0_i32, %c0_i32_0 : i32, i32
  }
  func.func @transform_3(%arg0: i32) -> (i32, i32) {
    %c0_i32 = arith.constant 0 : i32
    %c0_i32_0 = arith.constant 0 : i32
    %c0_i32_1 = arith.constant 0 : i32
    return %c0_i32, %c0_i32_0 : i32, i32
  }
  func.func @transform_4(%arg0: i32) -> (i32, i32) {
    %c0_i32 = arith.constant 0 : i32
    %c0_i32_0 = arith.constant 0 : i32
    %c0_i32_1 = arith.constant 0 : i32
    return %c0_i32, %c0_i32_0 : i32, i32
  }
  func.func @transform_5(%arg0: i32) -> (i32, i32) {
    %c0_i32 = arith.constant 0 : i32
    %c0_i32_0 = arith.constant 0 : i32
    %c0_i32_1 = arith.constant 0 : i32
    return %c0_i32, %c0_i32_0 : i32, i32
  }
  func.func @transform_6(%arg0: i32) -> (i32, i32) {
    %c0_i32 = arith.constant 0 : i32
    %c0_i32_0 = arith.constant 0 : i32
    %c0_i32_1 = arith.constant 0 : i32
    return %c0_i32, %c0_i32_0 : i32, i32
  }
  func.func @transform_7(%arg0: i32) -> (i32, i32) {
    %c0_i32 = arith.constant 0 : i32
    %c0_i32_0 = arith.constant 0 : i32
    %c0_i32_1 = arith.constant 0 : i32
    return %c0_i32, %c0_i32_0 : i32, i32
  }
  func.func @transform_8(%arg0: i32) -> (i32, i32) {
    %c0_i32 = arith.constant 0 : i32
    %c0_i32_0 = arith.constant 0 : i32
    %c0_i32_1 = arith.constant 0 : i32
    return %c0_i32, %c0_i32_0 : i32, i32
  }
  func.func @transform_9(%arg0: i32) -> (i32, i32) {
    %c0_i32 = arith.constant 0 : i32
    %c0_i32_0 = arith.constant 0 : i32
    %c0_i32_1 = arith.constant 0 : i32
    return %c0_i32, %c0_i32_0 : i32, i32
  }
  func.func @transform_10(%arg0: i32) -> (i32, i32) {
    %c0_i32 = arith.constant 0 : i32
    %c0_i32_0 = arith.constant 0 : i32
    %c0_i32_1 = arith.constant 0 : i32
    return %c0_i32, %c0_i32_0 : i32, i32
  }
  func.func @transform_11(%arg0: i32) -> (i32, i32) {
    %c0_i32 = arith.constant 0 : i32
    %c0_i32_0 = arith.constant 0 : i32
    %c0_i32_1 = arith.constant 0 : i32
    return %c0_i32, %c0_i32_0 : i32, i32
  }
  func.func @transform_12(%arg0: i32) -> (i32, i32) {
    %c0_i32 = arith.constant 0 : i32
    %c0_i32_0 = arith.constant 0 : i32
    %c0_i32_1 = arith.constant 0 : i32
    return %c0_i32, %c0_i32_0 : i32, i32
  }
  func.func @transform_13(%arg0: i32) -> (i32, i32) {
    %c0_i32 = arith.constant 0 : i32
    %c0_i32_0 = arith.constant 0 : i32
    %c0_i32_1 = arith.constant 0 : i32
    return %c0_i32, %c0_i32_0 : i32, i32
  }
  func.func @transform_14(%arg0: i32) -> (i32, i32) {
    %c0_i32 = arith.constant 0 : i32
    %c0_i32_0 = arith.constant 0 : i32
    %c0_i32_1 = arith.constant 0 : i32
    return %c0_i32, %c0_i32_0 : i32, i32
  }
  func.func @transform_15(%arg0: i32) -> (i32, i32) {
    %c0_i32 = arith.constant 0 : i32
    %c0_i32_0 = arith.constant 0 : i32
    return %c0_i32, %arg0 : i32, i32
  }
}

</mosaic_0001>

<bundles_post_ra>
// kernel: tpu_custom_call.1
= control target key start
LH: loop header
LB: loop body
LE: loop exit
PB: predicated region body
PF: predicated region fallthrough
CT: control target
= control target key end

     0   :  { %s4227_s0 = inlined_call_operand.vmem [shape: bf16[512,64], index: 0, kind: input, shape index: {}]   ;;  %s4228_s1 = inlined_call_operand.vmem [shape: bf16[64,128], index: 1, kind: input, shape index: {}]   ;;  %s4229_s2 = inlined_call_operand.vmem [shape: f32[1,128], index: 2, kind: input, shape index: {}]   ;;  %s4230_s3 = inlined_call_operand.vmem [shape: bf16[128,128], index: 3, kind: input, shape index: {}]   ;;  %s4231_s4 = inlined_call_operand.vmem [shape: f32[1,128], index: 4, kind: input, shape index: {}]   ;;  %s4232_s5 = inlined_call_operand.vmem [shape: bf16[128,128], index: 5, kind: input, shape index: {}]   ;;  %s4233_s6 = inlined_call_operand.vmem [shape: bf16[128,128], index: 6, kind: input, shape index: {}]   ;;  %s4234_s7 = inlined_call_operand.vmem [shape: f32[1,128], index: 7, kind: input, shape index: {}]   ;;  %s4235_s8 = inlined_call_operand.vmem [shape: f32[1,128], index: 8, kind: input, shape index: {}]   ;;  %s4236_s9 = inlined_call_operand.vmem [shape: bf16[128,128], index: 9, kind: input, shape index: {}]   ;;  %s4237_s10 = inlined_call_operand.vmem [shape: f32[1,128], index: 10, kind: input, shape index: {}]   ;;  %s4238_s11 = inlined_call_operand.vmem [shape: bf16[128,128], index: 11, kind: input, shape index: {}]   ;;  %s4239_s12 = inlined_call_operand.vmem [shape: f32[1,128], index: 12, kind: input, shape index: {}]   ;;  %s4240_s13 = inlined_call_operand.vmem [shape: bf16[1,128], index: 13, kind: input, shape index: {}]   ;;  %s4241_s14 = inlined_call_operand.<no memory space> [shape: f32[1,1], index: 14, kind: input, shape index: {}]   ;;  %s4242_s15 = inlined_call_operand.hbm [shape: f32[1,512], index: 15, kind: output, shape index: {}]  }
   0x1   :  { %4246 = sst [smem:[#allocation9_spill]] %s4227_s0  ;;  %v20_v0 = vstv %s4241_s14 }
   0x2   :  { %21 = vst [vmem:[#allocation2] sm:$0x1] %v20_v0 }
   0x3   :  { %22 = vsyncpa [#allocation4], 0 }
   0x4   :  { %24 = vsyncpa [#allocation4 + $0x1], 0  ;;  %s3318_s20 = smov 0   ;;  %s3320_s21 = smov 0  }
   0x5   :  { %s3322_s22 = smov 0   ;;  %s3324_s23 = smov 0  }
   0x6 LB: > { %4247 = sst [smem:[#allocation6_spill]] %s3227_s22  ;;  %s3339_s14 = sadd.s32 4294967295, %s3231_s23   ;;  %s3231_s23 = sphi %s3324_s23, %s4253_s23   ;;  %s3227_s22 = sphi %s3322_s22, %s4255_s22   ;;  %s3223_s21 = sphi %s3320_s21, %s4257_s21   ;;  %s3219_s20 = sphi %s3318_s20, %s4256_s20  }
   0x7   : > { %s2707_s24 = sadd.s32 4294967294, %s3231_s23   ;;  %s3343_s25 = sadd.s32 1, %s3231_s23  }
   0x8   : > { %4248 = sst [smem:[#allocation7_spill]] %s3343_s25  ;;  %s357_s26 = sadd.s32 1, %s3227_s22 }
   0x9   : > { %s354_s27 = ssub.s32 %s3231_s23, %s3343_s25  ;;  %p367_p0 = scmp.ne.s32.totalorder %s3227_s22, %s3223_s21 }
   0xa   : > { %p355_p1 = scmp.eq.s32.totalorder %s354_s27, 0  ;;  %p368_p2 = scmp.eq.s32.totalorder %s3339_s14, 1 }
   0xb   : > { %p373_p3 = scmp.ne.s32.totalorder %s3223_s21, %s3219_s20  ;;  %p374_p4 = scmp.eq.s32.totalorder %s2707_s24, 1 }
   0xc   : > { %s3354_s28 = scalar_select %p355_p1, %s3227_s22, %s357_s26  }
   0xd   : > { %p3356_p5 = por %p368_p2, %p367_p0  ;;  %p3360_p6 = por %p374_p4, %p373_p3 }
   0xe   : > { %4249 = sst [smem:[#allocation8_spill]] %s3354_s28  ;;  %p2710_p7 = scmp.ge.s32.totalorder %s3231_s23, 1 }
   0xf   : > { %p443_p8 = scmp.lt.s32.totalorder %s3231_s23, 3 }
  0x11   : > { %p444_p9 = pnand %p2710_p7, %p443_p8 }
  0x12   : > { %s2712_s18 = sshll.u32 (!%p444_p9), %s3339_s14, 5  ;;  %s4252_s0 = sld [smem:[#allocation9_spill]] (!%p444_p9) }
  0x13   : > { %447 = sbr.rel (%p444_p9) target bundleno = 1625 (0x659), region = 80  ;;  %p492_p10 = scmp.lt.s32.totalorder (!%p444_p9), %s2712_s18, 63 }
  0x14   : > { %s3233_s22 = smov (!%p444_p9), 64   ;;  %s3189_s26 = scalar_lea.hbm (!%p444_p9), %s4242_s15, 4 }
  0x18   : > { %v2993_v1 = vld [vmem:[%s4228_s1 + $0x18] sm:$0xff]  ;;  %v2992_v2 = vld [vmem:[%s4228_s1 + $0x10] sm:$0xff]  ;;  %s4259_s18 = smov (!%p492_p10, %s2712_s18), 63  ;;  %v2991_v3 = vld [vmem:[%s4228_s1 + $0x8] sm:$0xff]  ;;  %vm647_vm0 = vcmask 523264  }
  0x19   : > { %700 = vmatpush.bf16.msra.mxu0 %v2993_v1  ;;  %3034 = vmatpush.bf16.msra.mxu3 %v2993_v1  ;;  %s2713_s28 = sshll.u32 %s4259_s18, 2  ;;  %v2990_v4 = vld [vmem:[%s4228_s1] sm:$0xff]  ;;  %v3001_v12 = vld [vmem:[%s4230_s3 + $0x38] sm:$0xff]  ;;  %v3000_v13 = vld [vmem:[%s4230_s3 + $0x30] sm:$0xff] }
  0x1a   : > { %s3382_s19 = scalar_lea.vmem %s4252_s0, %s2713_s28  ;;  %901 = vmatpush.bf16.msra.mxu1 %v3001_v12  ;;  %v2999_v14 = vld [vmem:[%s4230_s3 + $0x28] sm:$0xff]  ;;  %v2998_v15 = vld [vmem:[%s4230_s3 + $0x20] sm:$0xff]  ;;  %v2997_v16 = vld [vmem:[%s4230_s3 + $0x18] sm:$0xff] }
  0x1b   : > { %v3385_v5 = vld [vmem:[%s3382_s19] sm:$0xff]  ;;  %v3390_v6 = vld [vmem:[%s3382_s19 + $0x8] sm:$0xff]  ;;  %v3395_v7 = vld [vmem:[%s3382_s19 + $0x10] sm:$0xff] }
  0x1c   : > { %v3398_v8 = vld [vmem:[%s3382_s19 + $0x20] sm:$0xff]  ;;  %990 = vrot.lane.b32.xlu0 %v3385_v5, %s3233_s22  ;;  %994 = vrot.lane.b32.xlu1 %v3395_v7, %s3233_s22  ;;  %v3407_v9 = vld [vmem:[%s3382_s19 + $0x18] sm:$0xff] }
  0x1d   : > { %701 = vmatpush.bf16.msra.mxu0 %v2992_v2  ;;  %3035 = vmatpush.bf16.msra.mxu3 %v2992_v2  ;;  %v3412_v10 = vld [vmem:[%s3382_s19 + $0x28] sm:$0xff]  ;;  %v3423_v11 = vld [vmem:[%s3382_s19 + $0x30] sm:$0xff]  ;;  %v2994_v19 = vld [vmem:[%s4230_s3] sm:$0xff] }
  0x1e   : > { %998 = vrot.lane.b32.xlu2 %v3398_v8, %s3233_s22  ;;  %902 = vmatpush.bf16.msra.mxu1 %v3000_v13  ;;  %v2996_v17 = vld [vmem:[%s4230_s3 + $0x10] sm:$0xff]  ;;  %v2995_v18 = vld [vmem:[%s4230_s3 + $0x8] sm:$0xff]  ;;  %v3458_v20 = vld [vmem:[%s3382_s19 + $0x38] sm:$0xff] }
  0x1f   : > { %v3463_v21 = vld [vmem:[%s3382_s19 + $0x40] sm:$0xff]  ;;  %v3475_v30 = vld [vmem:[%s3382_s19 + $0x48] sm:$0xff]  ;;  %v3482_v38 = vld [vmem:[%s3382_s19 + $0x50] sm:$0xff] }
  0x20   : > { %v3468_v23 = vld [vmem:[%s4229_s2] ss:$0 sm:$0xff]  ;;  %v3489_v46 = vld [vmem:[%s3382_s19 + $0x58] sm:$0xff]  ;;  %v3492_v48 = vld [vmem:[%s3382_s19 + $0x68] sm:$0xff] }
  0x21   : > { %702 = vmatpush.bf16.msra.mxu0 %v2991_v3  ;;  %3036 = vmatpush.bf16.msra.mxu3 %v2991_v3  ;;  %v3497_v49 = vld [vmem:[%s3382_s19 + $0x70] sm:$0xff]  ;;  %v3512_v56 = vld [vmem:[%s3382_s19 + $0x60] sm:$0xff]  ;;  %v3517_v58 = vld [vmem:[%s3382_s19 + $0x78] sm:$0xff]  ;;  %s488_s19 = sand.u32 1, %s3223_s21  }
  0x22   : > { %903 = vmatpush.bf16.msra.mxu1 %v2999_v14  ;;  %s2711_s18 = sshll.u32 %s488_s19, 1 }
  0x23   : > { %s490_s16 = scalar_lea.vmem [#allocation3], %s2711_s18 }
  0x24   : > { %992 = vrot.lane.b32.xlu0 %v3390_v6, %s3233_s22  ;;  %996 = vrot.lane.b32.xlu1 %v3407_v9, %s3233_s22  ;;  %s2645_s17 = sshll.u32 %s490_s16, 4  ;;  %s2646_s17 = int_to_ptr.vmem [resolvable:$true] %s2645_s17 }
  0x25   : > { %703 = vmatpush.bf16.msra.mxu0 %v2990_v4  ;;  %3037 = vmatpush.bf16.msra.mxu3 %v2990_v4 }
  0x26   : > { %1000 = vrot.lane.b32.xlu2 %v3412_v10, %s3233_s22  ;;  %904 = vmatpush.bf16.msra.mxu1 %v2998_v15 }
  0x28   : > { %2794 = vmatmul.msk.bf16.vlgmr.msra.gmra.mxu0 %vm647_vm0, %v3385_v5  ;;  %2808 = vmatmul.msk.bf16.vlgmr.msra.gmra.mxu3 %vm647_vm0, %v3497_v49 }
  0x29   : > { %3038 = vmatpush.bf16.msrb.mxu3 %v3001_v12 }
  0x2a   : > { %905 = vmatpush.bf16.msra.mxu1 %v2997_v16 }
  0x2c   : > { %1002 = vrot.lane.b32.xlu1 %v3423_v11, %s3233_s22  ;;  %1016 = vrot.lane.b32.xlu0 %v3492_v48, %s3233_s22 }
  0x2d   : > { %3039 = vmatpush.bf16.msrb.mxu3 %v3000_v13 }
  0x2e   : > { %906 = vmatpush.bf16.msra.mxu1 %v2996_v17  ;;  %1018 = vrot.lane.b32.xlu2 %v3497_v49, %s3233_s22 }
  0x31   : > { %3040 = vmatpush.bf16.msrb.mxu3 %v2999_v14 }
  0x32   : > { %907 = vmatpush.bf16.msra.mxu1 %v2995_v18 }
  0x34   : > { %1004 = vrot.lane.b32.xlu0 %v3458_v20, %s3233_s22  ;;  %1020 = vrot.lane.b32.xlu1 %v3517_v58, %s3233_s22 }
  0x35   : > { %3041 = vmatpush.bf16.msrb.mxu3 %v2998_v15  ;;  %v3009_v15 = vld [vmem:[%s4232_s5 + $0x38] sm:$0xff] }
  0x36   : > { %908 = vmatpush.bf16.msra.mxu1 %v2994_v19  ;;  %1006 = vrot.lane.b32.xlu2 %v3463_v21, %s3233_s22 }
  0x37   : > { %1278 = vmatpush.bf16.msra.mxu2 %v3009_v15 }
  0x38   : > { %2795 = vmatmul.msk.bf16.gmra.mxu0 %vm647_vm0, %v3390_v6  ;;  %2809 = vmatmul.msk.bf16.gmra.mxu3 %vm647_vm0, %v3517_v58 }
  0x39   : > { %3042 = vmatpush.bf16.msrb.mxu3 %v2997_v16 }
  0x3c   : > { %1008 = vrot.lane.b32.xlu0 %v3475_v30, %s3233_s22  ;;  %1010 = vrot.lane.b32.xlu1 %v3482_v38, %s3233_s22 }
  0x3d   : > { %3043 = vmatpush.bf16.msrb.mxu3 %v2996_v17  ;;  %v3008_v17 = vld [vmem:[%s4232_s5 + $0x30] sm:$0xff] }
  0x3e   : > { %1012 = vrot.lane.b32.xlu2 %v3489_v46, %s3233_s22  ;;  %1279 = vmatpush.bf16.msra.mxu2 %v3008_v17 }
  0x41   : > { %3044 = vmatpush.bf16.msrb.mxu3 %v2995_v18  ;;  %v3007_v18 = vld [vmem:[%s4232_s5 + $0x28] sm:$0xff] }
  0x42   : > { %1280 = vmatpush.bf16.msra.mxu2 %v3007_v18 }
  0x44   : > { %1014 = vrot.lane.b32.xlu0 %v3512_v56, %s3233_s22  ;;  %s2971_s22 = sshll.u32 %s3339_s14, 1  ;;  %s2633_s14 = scalar_lea.sflag [#allocation4], %s488_s19 }
  0x45   : > { %3045 = vmatpush.bf16.msrb.mxu3 %v2994_v19  ;;  %s2643_s27 = scalar_lea.hbm %s4242_s15, %s2971_s22 }
  0x46   : > { %s2647_s25 = sshll.u32 %s2643_s27, 4  ;;  %s2648_s25 = int_to_ptr.hbm [resolvable:$true] %s2647_s25 }
  0x47   : > { %s3183_s28 = sshra.s32 %s2648_s25, 4  ;;  %s3184_s28 = int_to_ptr.hbm [resolvable:$true] %s3183_s28 }
  0x48   : > { %2796 = vmatmul.msk.bf16.gmra.mxu0 %vm647_vm0, %v3395_v7  ;;  %s3185_s22 = scalar_lea.hbm %s3184_s28, 2  ;;  %p3190_p0 = scmp.lt.s32.totalorder %s3184_s28, %s4242_s15 }
  0x49   : > { %3046 = vmatpush.bf16.msra.mxu3 %v3009_v15  ;;  %p3186_p11 = scmp.ne.s32.totalorder %s3184_s28, %s3185_s22  ;;  %p3191_p1 = scmp.lt.s32.totalorder %s3189_s26, %s3185_s22 }
  0x4b   : > { %p3187_p12 = pnand %p3186_p11, %p3356_p5  ;;  %p3192_p2 = por %p3191_p1, %p3190_p0 }
  0x4d   : > { %3047 = vmatpush.bf16.msra.mxu3 %v3008_v17  ;;  %p3188_p13 = pneg %p3187_p12 }
  0x4f   : > { %p3193_p3 = pnand %p3192_p2, %p3188_p13 }
  0x51   : > { %3048 = vmatpush.bf16.msra.mxu3 %v3007_v18 }
  0x58   : > { %2797 = vmatmul.msk.bf16.gmra.mxu0 %vm647_vm0, %v3407_v9 }
  0x68   : > { %2798 = vmatmul.msk.bf16.gmra.mxu0 %vm647_vm0, %v3398_v8 }
  0x78   : > { %2799 = vmatmul.msk.bf16.gmra.mxu0 %vm647_vm0, %v3412_v10 }
  0x88   : > { %2800 = vmatmul.msk.bf16.gmra.mxu0 %vm647_vm0, %v3423_v11 }
  0x98   : > { %2801 = vmatmul.msk.bf16.gmra.mxu0 %vm647_vm0, %v3458_v20 }
  0xa5   : > { %v705_v22 = vpop.f32.mrf.mxu0 }
  0xa6   : > { %v706_v24 = vadd.f32 %v3468_v23, %v705_v22 }
  0xa8   : > { %2802 = vmatmul.msk.bf16.gmra.mxu0 %vm647_vm0, %v3463_v21  ;;  %v785_v27 = vmax.f32 %v706_v24, 0.0 }
  0xad   : > { %v707_v25 = vpop.f32.mrf.mxu0 }
  0xae   : > { %v708_v26 = vadd.f32 %v3468_v23, %v707_v25  ;;  %v3006_v25 = vld [vmem:[%s4232_s5 + $0x20] sm:$0xff] }
  0xaf   : > { %1281 = vmatpush.bf16.msra.mxu2 %v3006_v25  ;;  %3049 = vmatpush.bf16.msra.mxu3 %v3006_v25 }
  0xb0   : > { %v786_v28 = vmax.f32 %v708_v26, 0.0 }
  0xb2   : > { %v817_v29 = vpack.c.bf16 %v786_v28, %v785_v27 }
  0xb4   : > { %909 = vmatmul.bf16.vlgmr.msra.gmra.mxu1 %v817_v29  ;;  %v3005_v29 = vld [vmem:[%s4232_s5 + $0x18] sm:$0xff] }
  0xb5   : > { %v710_v31 = vpop.f32.mrf.mxu0  ;;  %1282 = vmatpush.bf16.msra.mxu2 %v3005_v29  ;;  %3050 = vmatpush.bf16.msra.mxu3 %v3005_v29 }
  0xb6   : > { %v711_v32 = vadd.f32 %v3468_v23, %v710_v31 }
  0xb8   : > { %2803 = vmatmul.msk.bf16.gmra.mxu0 %vm647_vm0, %v3475_v30  ;;  %v787_v35 = vmax.f32 %v711_v32, 0.0  ;;  %v3004_v32 = vld [vmem:[%s4232_s5 + $0x10] sm:$0xff] }
  0xb9   : > { %1283 = vmatpush.bf16.msra.mxu2 %v3004_v32  ;;  %3051 = vmatpush.bf16.msra.mxu3 %v3004_v32 }
  0xbd   : > { %v712_v33 = vpop.f32.mrf.mxu0 }
  0xbe   : > { %v713_v34 = vadd.f32 %v3468_v23, %v712_v33  ;;  %v3003_v33 = vld [vmem:[%s4232_s5 + $0x8] sm:$0xff] }
  0xbf   : > { %1284 = vmatpush.bf16.msra.mxu2 %v3003_v33  ;;  %3052 = vmatpush.bf16.msra.mxu3 %v3003_v33 }
  0xc0   : > { %v788_v36 = vmax.f32 %v713_v34, 0.0 }
  0xc2   : > { %v818_v37 = vpack.c.bf16 %v788_v36, %v787_v35 }
  0xc4   : > { %914 = vmatmul.bf16.gmra.mxu1 %v818_v37  ;;  %v3002_v37 = vld [vmem:[%s4232_s5] sm:$0xff] }
  0xc5   : > { %v715_v39 = vpop.f32.mrf.mxu0  ;;  %1285 = vmatpush.bf16.msra.mxu2 %v3002_v37  ;;  %3053 = vmatpush.bf16.msra.mxu3 %v3002_v37 }
  0xc6   : > { %v716_v40 = vadd.f32 %v3468_v23, %v715_v39 }
  0xc8   : > { %2804 = vmatmul.msk.bf16.gmra.mxu0 %vm647_vm0, %v3482_v38  ;;  %v789_v43 = vmax.f32 %v716_v40, 0.0 }
  0xcd   : > { %v717_v41 = vpop.f32.mrf.mxu0 }
  0xce   : > { %v718_v42 = vadd.f32 %v3468_v23, %v717_v41 }
  0xd0   : > { %v790_v44 = vmax.f32 %v718_v42, 0.0 }
  0xd2   : > { %v819_v45 = vpack.c.bf16 %v790_v44, %v789_v43 }
  0xd4   : > { %919 = vmatmul.bf16.gmra.mxu1 %v819_v45 }
  0xd5   : > { %v720_v47 = vpop.f32.mrf.mxu0 }
  0xd6   : > { %v721_v50 = vadd.f32 %v3468_v23, %v720_v47 }
  0xd8   : > { %2805 = vmatmul.msk.bf16.gmra.mxu0 %vm647_vm0, %v3489_v46  ;;  %v791_v53 = vmax.f32 %v721_v50, 0.0 }
  0xdd   : > { %v722_v51 = vpop.f32.mrf.mxu0 }
  0xde   : > { %v723_v52 = vadd.f32 %v3468_v23, %v722_v51  ;;  %v3570_v51 = vld [vmem:[%s4231_s4] ss:$0 sm:$0xff] }
  0xe0   : > { %v792_v54 = vmax.f32 %v723_v52, 0.0 }
  0xe2   : > { %v820_v55 = vpack.c.bf16 %v792_v54, %v791_v53 }
  0xe4   : > { %924 = vmatmul.bf16.gmra.mxu1 %v820_v55  ;;  %v991_v55 = vpop.permute.xlu0 %990 }
  0xe5   : > { %v725_v57 = vpop.f32.mrf.mxu0 }
  0xe6   : > { %v726_v59 = vadd.f32 %v3468_v23, %v725_v57 }
  0xe8   : > { %2806 = vmatmul.msk.bf16.gmra.mxu0 %vm647_vm0, %v3512_v56  ;;  %v793_v62 = vmax.f32 %v726_v59, 0.0 }
  0xed   : > { %v727_v60 = vpop.f32.mrf.mxu0 }
  0xee   : > { %v728_v61 = vadd.f32 %v3468_v23, %v727_v60  ;;  %v1023_v60 = vsel %vm647_vm0, %v3385_v5, %v991_v55 }
  0xf0   : > { %v794_v63 = vmax.f32 %v728_v61, 0.0 }
  0xf2   : > { %v821_v0 = vpack.c.bf16 %v794_v63, %v793_v62  ;;  %v1134_v63 = vunpack.c.l.bf16 %v1023_v60 }
  0xf4   : > { %929 = vmatmul.bf16.gmra.mxu1 %v821_v0 }
  0xf5   : > { %v730_v1 = vpop.f32.mrf.mxu0 }
  0xf6   : > { %v731_v2 = vadd.f32 %v3468_v23, %v730_v1  ;;  %v1135_v1 = vunpack.c.h.bf16 %v1023_v60 }
  0xf8   : > { %2807 = vmatmul.msk.bf16.gmra.mxu0 %vm647_vm0, %v3492_v48  ;;  %v795_v12 = vmax.f32 %v731_v2, 0.0 }
  0xfd   : > { %v732_v3 = vpop.f32.mrf.mxu0 }
  0xfe   : > { %v733_v4 = vadd.f32 %v3468_v23, %v732_v3 }
 0x100   : > { %v796_v13 = vmax.f32 %v733_v4, 0.0 }
 0x102   : > { %v822_v14 = vpack.c.bf16 %v796_v13, %v795_v12 }
 0x104   : > { %934 = vmatmul.bf16.gmra.mxu1 %v822_v14 }
 0x105   : > { %v735_v16 = vpop.f32.mrf.mxu0 }
 0x106   : > { %v736_v19 = vadd.f32 %v3468_v23, %v735_v16 }
 0x108   : > { %v797_v26 = vmax.f32 %v736_v19, 0.0 }
 0x10d   : > { %v737_v22 = vpop.f32.mrf.mxu0 }
 0x10e   : > { %v738_v24 = vadd.f32 %v3468_v23, %v737_v22 }
 0x110   : > { %v798_v27 = vmax.f32 %v738_v24, 0.0  ;;  %v993_v24 = vpop.permute.xlu0 %992 }
 0x112   : > { %v823_v28 = vpack.c.bf16 %v798_v27, %v797_v26  ;;  %v1026_v27 = vsel %vm647_vm0, %v3390_v6, %v993_v24 }
 0x113   : > { %v1137_v33 = vunpack.c.h.bf16 %v1026_v27 }
 0x114   : > { %939 = vmatmul.bf16.gmra.mxu1 %v823_v28 }
 0x115   : > { %v740_v31 = vpop.f32.mrf.mxu0 }
 0x116   : > { %v741_v34 = vadd.f32 %v3468_v23, %v740_v31  ;;  %v1136_v31 = vunpack.c.l.bf16 %v1026_v27 }
 0x118   : > { %v799_v39 = vmax.f32 %v741_v34, 0.0 }
 0x11d   : > { %v742_v35 = vpop.f32.mrf.mxu0 }
 0x11e   : > { %v743_v36 = vadd.f32 %v3468_v23, %v742_v35 }
 0x120   : > { %v800_v40 = vmax.f32 %v743_v36, 0.0 }
 0x122   : > { %v824_v41 = vpack.c.bf16 %v800_v40, %v799_v39 }
 0x124   : > { %944 = vmatmul.bf16.gmra.mxu1 %v824_v41 }
 0x125   : > { %v745_v42 = vpop.f32.mrf.mxu0 }
 0x126   : > { %v746_v43 = vadd.f32 %v3468_v23, %v745_v42 }
 0x128   : > { %v801_v47 = vmax.f32 %v746_v43, 0.0 }
 0x12d   : > { %v747_v44 = vpop.f32.mrf.mxu0 }
 0x12e   : > { %v748_v45 = vadd.f32 %v3468_v23, %v747_v44 }
 0x130   : > { %v802_v50 = vmax.f32 %v748_v45, 0.0 }
 0x131   : > { %v910_v52 = vpop.f32.mrf.mxu1 }
 0x132   : > { %v825_v53 = vpack.c.bf16 %v802_v50, %v801_v47  ;;  %v911_v54 = vadd.f32 %v3570_v51, %v910_v52  ;;  %v995_v50 = vpop.permute.xlu1 %994 }
 0x134   : > { %949 = vmatmul.bf16.gmra.mxu1 %v825_v53  ;;  %v1070_v59 = vpack.c.bf16 %v911_v54, %v911_v54  ;;  %v1029_v54 = vsel %vm647_vm0, %v3395_v7, %v995_v50 }
 0x135   : > { %v750_v57 = vpop.f32.mrf.mxu0 }
 0x136   : > { %v1102_v0 = vunpack.c.l.bf16 %v1070_v59  ;;  %v751_v2 = vadd.f32 %v3468_v23, %v750_v57  ;;  %v1138_v59 = vunpack.c.l.bf16 %v1029_v54 }
 0x138   : > { %v803_v14 = vmax.f32 %v751_v2, 0.0  ;;  %v1166_v16 = vmul.f32 %v1134_v63, %v1102_v0 }
 0x139   : > { %v912_v61 = vpop.f32.mrf.mxu1 }
 0x13a   : > { %v913_v62 = vadd.f32 %v3570_v51, %v912_v61  ;;  %v1139_v61 = vunpack.c.h.bf16 %v1029_v54 }
 0x13c   : > { %v1071_v3 = vpack.c.bf16 %v913_v62, %v913_v62 }
 0x13d   : > { %v752_v4 = vpop.f32.mrf.mxu0 }
 0x13e   : > { %v1103_v12 = vunpack.c.l.bf16 %v1071_v3  ;;  %v753_v13 = vadd.f32 %v3468_v23, %v752_v4 }
 0x140   : > { %v804_v15 = vmax.f32 %v753_v13, 0.0  ;;  %v1167_v17 = vmul.f32 %v1135_v1, %v1103_v12 }
 0x141   : > { %v915_v18 = vpop.f32.mrf.mxu1 }
 0x142   : > { %v826_v19 = vpack.c.bf16 %v804_v15, %v803_v14  ;;  %v1198_v5 = vpack.c.bf16 %v1167_v17, %v1166_v16  ;;  %v916_v22 = vadd.f32 %v3570_v51, %v915_v18  ;;  %v997_v17 = vpop.permute.xlu1 %996 }
 0x144   : > { %954 = vmatmul.bf16.gmra.mxu1 %v826_v19  ;;  %1286 = vmatmul.bf16.vlgmr.msra.gmra.mxu2 %v1198_v5  ;;  %v1072_v26 = vpack.c.bf16 %v916_v22, %v916_v22  ;;  %v1032_v5 = vsel %vm647_vm0, %v3407_v9, %v997_v17 }
 0x145   : > { %v755_v25 = vpop.f32.mrf.mxu0  ;;  %v1141_v27 = vunpack.c.h.bf16 %v1032_v5 }
 0x146   : > { %v1104_v32 = vunpack.c.l.bf16 %v1072_v26  ;;  %v756_v34 = vadd.f32 %v3468_v23, %v755_v25  ;;  %v1140_v25 = vunpack.c.l.bf16 %v1032_v5 }
 0x148   : > { %v805_v40 = vmax.f32 %v756_v34, 0.0  ;;  %v1168_v42 = vmul.f32 %v1136_v31, %v1104_v32 }
 0x149   : > { %v917_v28 = vpop.f32.mrf.mxu1 }
 0x14a   : > { %v918_v29 = vadd.f32 %v3570_v51, %v917_v28 }
 0x14c   : > { %v1073_v35 = vpack.c.bf16 %v918_v29, %v918_v29 }
 0x14d   : > { %v757_v36 = vpop.f32.mrf.mxu0 }
 0x14e   : > { %v1105_v37 = vunpack.c.l.bf16 %v1073_v35  ;;  %v758_v39 = vadd.f32 %v3468_v23, %v757_v36 }
 0x150   : > { %v806_v41 = vmax.f32 %v758_v39, 0.0  ;;  %v1169_v43 = vmul.f32 %v1137_v33, %v1105_v37 }
 0x151   : > { %v920_v44 = vpop.f32.mrf.mxu1 }
 0x152   : > { %v827_v45 = vpack.c.bf16 %v806_v41, %v805_v40  ;;  %v1199_v6 = vpack.c.bf16 %v1169_v43, %v1168_v42  ;;  %v921_v47 = vadd.f32 %v3570_v51, %v920_v44  ;;  %v999_v42 = vpop.permute.xlu2 %998 }
 0x154   : > { %959 = vmatmul.bf16.gmra.mxu1 %v827_v45  ;;  %1291 = vmatmul.bf16.gmra.mxu2 %v1199_v6  ;;  %v1074_v53 = vpack.c.bf16 %v921_v47, %v921_v47  ;;  %v1035_v45 = vsel %vm647_vm0, %v3398_v8, %v999_v42  ;;  %v775_v47 = vpop.f32.mrf.mxu3 }
 0x155   : > { %v760_v52 = vpop.f32.mrf.mxu0  ;;  %v1143_v54 = vunpack.c.h.bf16 %v1035_v45 }
 0x156   : > { %v1106_v60 = vunpack.c.l.bf16 %v1074_v53  ;;  %v761_v62 = vadd.f32 %v3468_v23, %v760_v52  ;;  %v1142_v52 = vunpack.c.l.bf16 %v1035_v45 }
 0x158   : > { %v807_v3 = vmax.f32 %v761_v62, 0.0  ;;  %v1170_v12 = vmul.f32 %v1138_v59, %v1106_v60 }
 0x159   : > { %v922_v55 = vpop.f32.mrf.mxu1 }
 0x15a   : > { %v923_v57 = vadd.f32 %v3570_v51, %v922_v55 }
 0x15c   : > { %v1075_v63 = vpack.c.bf16 %v923_v57, %v923_v57 }
 0x15d   : > { %v762_v0 = vpop.f32.mrf.mxu0 }
 0x15e   : > { %v1107_v1 = vunpack.c.l.bf16 %v1075_v63  ;;  %v763_v2 = vadd.f32 %v3468_v23, %v762_v0 }
 0x160   : > { %v808_v4 = vmax.f32 %v763_v2, 0.0  ;;  %v1171_v13 = vmul.f32 %v1139_v61, %v1107_v1 }
 0x161   : > { %v925_v14 = vpop.f32.mrf.mxu1 }
 0x162   : > { %v828_v15 = vpack.c.bf16 %v808_v4, %v807_v3  ;;  %v1200_v7 = vpack.c.bf16 %v1171_v13, %v1170_v12  ;;  %v926_v16 = vadd.f32 %v3570_v51, %v925_v14  ;;  %v777_v4 = vpop.f32.mrf.mxu3  ;;  %v1001_v13 = vpop.permute.xlu2 %1000 }
 0x163   : > { %v778_v17 = vadd.f32 %v3468_v23, %v777_v4 }
 0x164   : > { %964 = vmatmul.bf16.gmra.mxu1 %v828_v15  ;;  %1296 = vmatmul.bf16.gmra.mxu2 %v1200_v7  ;;  %v1076_v19 = vpack.c.bf16 %v926_v16, %v926_v16  ;;  %v1038_v15 = vsel %vm647_vm0, %v3412_v10, %v1001_v13  ;;  %v776_v16 = vadd.f32 %v3468_v23, %v775_v47  ;;  %v3614_v47 = vpop.permute.xlu0 %1016 }
 0x165   : > { %v765_v18 = vpop.f32.mrf.mxu0  ;;  %v1144_v5 = vunpack.c.l.bf16 %v1038_v15 }
 0x166   : > { %v1108_v26 = vunpack.c.l.bf16 %v1076_v19  ;;  %v766_v28 = vadd.f32 %v3468_v23, %v765_v18 }
 0x168   : > { %v809_v34 = vmax.f32 %v766_v28, 0.0  ;;  %v1172_v36 = vmul.f32 %v1140_v25, %v1108_v26  ;;  %v813_v26 = vmax.f32 %v776_v16, 0.0 }
 0x169   : > { %v927_v22 = vpop.f32.mrf.mxu1 }
 0x16a   : > { %v928_v24 = vadd.f32 %v3570_v51, %v927_v22  ;;  %v1145_v22 = vunpack.c.h.bf16 %v1038_v15  ;;  %v780_v25 = vpop.f32.mrf.mxu3  ;;  %v3620_v4 = vpop.permute.xlu2 %1018 }
 0x16c   : > { %v1077_v29 = vpack.c.bf16 %v928_v24, %v928_v24 }
 0x16d   : > { %v767_v31 = vpop.f32.mrf.mxu0 }
 0x16e   : > { %v1109_v32 = vunpack.c.l.bf16 %v1077_v29  ;;  %v768_v33 = vadd.f32 %v3468_v23, %v767_v31 }
 0x170   : > { %v810_v35 = vmax.f32 %v768_v33, 0.0  ;;  %v1173_v37 = vmul.f32 %v1141_v27, %v1109_v32  ;;  %v814_v27 = vmax.f32 %v778_v17, 0.0 }
 0x171   : > { %v930_v39 = vpop.f32.mrf.mxu1 }
 0x172   : > { %v829_v40 = vpack.c.bf16 %v810_v35, %v809_v34  ;;  %v1201_v9 = vpack.c.bf16 %v1173_v37, %v1172_v36  ;;  %v931_v41 = vadd.f32 %v3570_v51, %v930_v39  ;;  %v831_v33 = vpack.c.bf16 %v814_v27, %v813_v26  ;;  %v1003_v35 = vpop.permute.xlu1 %1002  ;;  %v782_v36 = vpop.f32.mrf.mxu3 }
 0x173   : > { %v1041_v39 = vsel %vm647_vm0, %v3423_v11, %v1003_v35  ;;  %v1007_v17 = vpop.permute.xlu2 %1006 }
 0x174   : > { %969 = vmatmul.bf16.gmra.mxu1 %v829_v40  ;;  %1301 = vmatmul.bf16.gmra.mxu2 %v1201_v9  ;;  %v1078_v44 = vpack.c.bf16 %v931_v41, %v931_v41  ;;  %v781_v9 = vadd.f32 %v3468_v23, %v780_v25  ;;  %v783_v41 = vadd.f32 %v3468_v23, %v782_v36  ;;  %v1147_v45 = vunpack.c.h.bf16 %v1041_v39 }
 0x175   : > { %v770_v43 = vpop.f32.mrf.mxu0 }
 0x176   : > { %v1110_v53 = vunpack.c.l.bf16 %v1078_v44  ;;  %v771_v55 = vadd.f32 %v3468_v23, %v770_v43  ;;  %v1146_v44 = vunpack.c.l.bf16 %v1041_v39 }
 0x178   : > { %v811_v62 = vmax.f32 %v771_v55, 0.0  ;;  %v1174_v0 = vmul.f32 %v1142_v52, %v1110_v53  ;;  %v816_v52 = vmax.f32 %v783_v41, 0.0 }
 0x179   : > { %v932_v6 = vpop.f32.mrf.mxu1 }
 0x17a   : > { %v933_v50 = vadd.f32 %v3570_v51, %v932_v6  ;;  %v3630_v41 = vpop.permute.xlu1 %1020 }
 0x17c   : > { %v1079_v57 = vpack.c.bf16 %v933_v50, %v933_v50  ;;  %v815_v50 = vmax.f32 %v781_v9, 0.0 }
 0x17d   : > { %v772_v59 = vpop.f32.mrf.mxu0 }
 0x17e   : > { %v1111_v60 = vunpack.c.l.bf16 %v1079_v57  ;;  %v773_v61 = vadd.f32 %v3468_v23, %v772_v59  ;;  %v832_v11 = vpack.c.bf16 %v816_v52, %v815_v50  ;;  %v1005_v23 = vpop.permute.xlu0 %1004 }
 0x180   : > { %v812_v63 = vmax.f32 %v773_v61, 0.0  ;;  %v1175_v1 = vmul.f32 %v1143_v54, %v1111_v60 }
 0x181   : > { %v935_v2 = vpop.f32.mrf.mxu1 }
 0x182   : > { %v830_v8 = vpack.c.bf16 %v812_v63, %v811_v62  ;;  %v1202_v3 = vpack.c.bf16 %v1175_v1, %v1174_v0  ;;  %v936_v12 = vadd.f32 %v3570_v51, %v935_v2  ;;  %v1044_v62 = vsel %vm647_vm0, %v3458_v20, %v1005_v23  ;;  %v1011_v52 = vpop.permute.xlu1 %1010 }
 0x183   : > { %v1148_v2 = vunpack.c.l.bf16 %v1044_v62  ;;  %v1047_v20 = vsel %vm647_vm0, %v3463_v21, %v1007_v17 }
 0x184   : > { %974 = vmatmul.bf16.vlgmr.msrb.gmra.mxu3 %v830_v8  ;;  %1306 = vmatmul.bf16.gmra.mxu2 %v1202_v3  ;;  %v1080_v14 = vpack.c.bf16 %v936_v12, %v936_v12  ;;  %v1149_v8 = vunpack.c.h.bf16 %v1044_v62  ;;  %v1151_v25 = vunpack.c.h.bf16 %v1047_v20 }
 0x186   : > { %v1112_v19 = vunpack.c.l.bf16 %v1080_v14 }
 0x188   : > { %v1176_v29 = vmul.f32 %v1144_v5, %v1112_v19 }
 0x189   : > { %v937_v7 = vpop.f32.mrf.mxu1 }
 0x18a   : > { %v938_v18 = vadd.f32 %v3570_v51, %v937_v7 }
 0x18c   : > { %v1081_v24 = vpack.c.bf16 %v938_v18, %v938_v18 }
 0x18e   : > { %v1113_v28 = vunpack.c.l.bf16 %v1081_v24  ;;  %v1150_v24 = vunpack.c.l.bf16 %v1047_v20 }
 0x190   : > { %v1177_v31 = vmul.f32 %v1145_v22, %v1113_v28 }
 0x191   : > { %v940_v32 = vpop.f32.mrf.mxu1 }
 0x192   : > { %v1203_v10 = vpack.c.bf16 %v1177_v31, %v1176_v29  ;;  %v941_v34 = vadd.f32 %v3570_v51, %v940_v32 }
 0x194   : > { %979 = vmatmul.bf16.gmra.mxu3 %v831_v33  ;;  %1311 = vmatmul.bf16.gmra.mxu2 %v1203_v10  ;;  %v1082_v37 = vpack.c.bf16 %v941_v34, %v941_v34  ;;  %v1009_v10 = vpop.permute.xlu0 %1008 }
 0x195   : > { %v1050_v21 = vsel %vm647_vm0, %v3475_v30, %v1009_v10  ;;  %v1053_v30 = vsel %vm647_vm0, %v3482_v38, %v1011_v52 }
 0x196   : > { %v1114_v43 = vunpack.c.l.bf16 %v1082_v37  ;;  %v1152_v39 = vunpack.c.l.bf16 %v1050_v21 }
 0x198   : > { %v1178_v54 = vmul.f32 %v1146_v44, %v1114_v43 }
 0x199   : > { %v942_v40 = vpop.f32.mrf.mxu1 }
 0x19a   : > { %v943_v42 = vadd.f32 %v3570_v51, %v942_v40  ;;  %v1153_v40 = vunpack.c.h.bf16 %v1050_v21 }
 0x19c   : > { %v1083_v6 = vpack.c.bf16 %v943_v42, %v943_v42 }
 0x19e   : > { %v1115_v53 = vunpack.c.l.bf16 %v1083_v6 }
 0x1a0   : > { %v1179_v55 = vmul.f32 %v1147_v45, %v1115_v53 }
 0x1a1   : > { %v945_v57 = vpop.f32.mrf.mxu1 }
 0x1a2   : > { %v1204_v59 = vpack.c.bf16 %v1179_v55, %v1178_v54  ;;  %v946_v60 = vadd.f32 %v3570_v51, %v945_v57 }
 0x1a4   : > { %984 = vmatmul.bf16.gmra.mxu3 %v832_v11  ;;  %1316 = vmatmul.bf16.gmra.mxu2 %v1204_v59  ;;  %v1084_v61 = vpack.c.bf16 %v946_v60, %v946_v60  ;;  %v1154_v11 = vunpack.c.l.bf16 %v1053_v30  ;;  %v1155_v59 = vunpack.c.h.bf16 %v1053_v30 }
 0x1a6   : > { %v1116_v1 = vunpack.c.l.bf16 %v1084_v61 }
 0x1a8   : > { %v1180_v13 = vmul.f32 %v1148_v2, %v1116_v1  ;;  %v1013_v2 = vpop.permute.xlu2 %1012 }
 0x1a9   : > { %v947_v63 = vpop.f32.mrf.mxu1  ;;  %v1056_v38 = vsel %vm647_vm0, %v3489_v46, %v1013_v2 }
 0x1aa   : > { %v948_v0 = vadd.f32 %v3570_v51, %v947_v63 }
 0x1ac   : > { %v1085_v3 = vpack.c.bf16 %v948_v0, %v948_v0 }
 0x1ae   : > { %v1117_v12 = vunpack.c.l.bf16 %v1085_v3 }
 0x1b0   : > { %v1181_v14 = vmul.f32 %v1149_v8, %v1117_v12 }
 0x1b1   : > { %v950_v15 = vpop.f32.mrf.mxu1 }
 0x1b2   : > { %v1205_v7 = vpack.c.bf16 %v1181_v14, %v1180_v13  ;;  %v951_v16 = vadd.f32 %v3570_v51, %v950_v15  ;;  %v1156_v14 = vunpack.c.l.bf16 %v1056_v38  ;;  %v1157_v15 = vunpack.c.h.bf16 %v1056_v38 }
 0x1b4   : > { %1321 = vmatmul.bf16.gmra.mxu2 %v1205_v7  ;;  %v1086_v18 = vpack.c.bf16 %v951_v16, %v951_v16 }
 0x1b6   : > { %v1118_v22 = vunpack.c.l.bf16 %v1086_v18 }
 0x1b8   : > { %v1182_v28 = vmul.f32 %v1150_v24, %v1118_v22  ;;  %v1015_v22 = vpop.permute.xlu0 %1014 }
 0x1b9   : > { %v952_v19 = vpop.f32.mrf.mxu1  ;;  %v1059_v46 = vsel %vm647_vm0, %v3512_v56, %v1015_v22  ;;  %v3017_v56 = vld [vmem:[%s4233_s6 + $0x38] sm:$0xff] }
 0x1ba   : > { %v953_v5 = vadd.f32 %v3570_v51, %v952_v19  ;;  %1447 = vmatpush.bf16.msrb.mxu3 %v3017_v56  ;;  %1616 = vmatpush.bf16.msrb.mxu0 %v3017_v56 }
 0x1bc   : > { %v1087_v26 = vpack.c.bf16 %v953_v5, %v953_v5 }
 0x1be   : > { %v1119_v27 = vunpack.c.l.bf16 %v1087_v26 }
 0x1c0   : > { %v1183_v29 = vmul.f32 %v1151_v25, %v1119_v27 }
 0x1c1   : > { %v955_v31 = vpop.f32.mrf.mxu1 }
 0x1c2   : > { %v1206_v32 = vpack.c.bf16 %v1183_v29, %v1182_v28  ;;  %v956_v33 = vadd.f32 %v3570_v51, %v955_v31  ;;  %v1158_v29 = vunpack.c.l.bf16 %v1059_v46  ;;  %v1159_v31 = vunpack.c.h.bf16 %v1059_v46 }
 0x1c4   : > { %1326 = vmatmul.bf16.gmra.mxu2 %v1206_v32  ;;  %v1088_v34 = vpack.c.bf16 %v956_v33, %v956_v33 }
 0x1c6   : > { %v1120_v37 = vunpack.c.l.bf16 %v1088_v34 }
 0x1c7   : > { %v3643_v26 = vpop.f32.mrf.mxu2 }
 0x1c8   : > { %v1184_v43 = vmul.f32 %v1152_v39, %v1120_v37  ;;  %v3016_v39 = vld [vmem:[%s4233_s6 + $0x30] sm:$0xff] }
 0x1c9   : > { %v957_v35 = vpop.f32.mrf.mxu1  ;;  %1448 = vmatpush.bf16.msrb.mxu3 %v3016_v39  ;;  %1617 = vmatpush.bf16.msrb.mxu0 %v3016_v39 }
 0x1ca   : > { %v958_v36 = vadd.f32 %v3570_v51, %v957_v35 }
 0x1cc   : > { %v1089_v9 = vpack.c.bf16 %v958_v36, %v958_v36 }
 0x1ce   : > { %v1121_v42 = vunpack.c.l.bf16 %v1089_v9  ;;  %v1062_v9 = vsel %vm647_vm0, %v3492_v48, %v3614_v47  ;;  %v3014_v48 = vld [vmem:[%s4233_s6 + $0x20] sm:$0xff] }
 0x1cf   : > { %v3646_v35 = vpop.f32.mrf.mxu2 }
 0x1d0   : > { %v1185_v44 = vmul.f32 %v1153_v40, %v1121_v42 }
 0x1d1   : > { %v960_v45 = vpop.f32.mrf.mxu1 }
 0x1d2   : > { %v1207_v6 = vpack.c.bf16 %v1185_v44, %v1184_v43  ;;  %v961_v50 = vadd.f32 %v3570_v51, %v960_v45  ;;  %v3015_v44 = vld [vmem:[%s4233_s6 + $0x28] sm:$0xff]  ;;  %v1160_v45 = vunpack.c.l.bf16 %v1062_v9 }
 0x1d3   : > { %1449 = vmatpush.bf16.msrb.mxu3 %v3015_v44  ;;  %1618 = vmatpush.bf16.msrb.mxu0 %v3015_v44 }
 0x1d4   : > { %1331 = vmatmul.bf16.gmra.mxu2 %v1207_v6  ;;  %v1090_v53 = vpack.c.bf16 %v961_v50, %v961_v50  ;;  %v1161_v6 = vunpack.c.h.bf16 %v1062_v9 }
 0x1d6   : > { %v1122_v57 = vunpack.c.l.bf16 %v1090_v53 }
 0x1d7   : > { %1450 = vmatpush.bf16.msrb.mxu3 %v3014_v48  ;;  %1619 = vmatpush.bf16.msrb.mxu0 %v3014_v48 }
 0x1d8   : > { %v1186_v61 = vmul.f32 %v1154_v11, %v1122_v57  ;;  %v3013_v57 = vld [vmem:[%s4233_s6 + $0x18] sm:$0xff] }
 0x1d9   : > { %v962_v54 = vpop.f32.mrf.mxu1 }
 0x1da   : > { %v963_v55 = vadd.f32 %v3570_v51, %v962_v54 }
 0x1db   : > { %1451 = vmatpush.bf16.msrb.mxu3 %v3013_v57  ;;  %1620 = vmatpush.bf16.msrb.mxu0 %v3013_v57 }
 0x1dc   : > { %v1091_v60 = vpack.c.bf16 %v963_v55, %v963_v55 }
 0x1de   : > { %v1123_v23 = vunpack.c.l.bf16 %v1091_v60 }
 0x1e0   : > { %v1187_v62 = vmul.f32 %v1155_v59, %v1123_v23  ;;  %v3012_v59 = vld [vmem:[%s4233_s6 + $0x10] sm:$0xff]  ;;  %v1065_v23 = vsel %vm647_vm0, %v3497_v49, %v3620_v4  ;;  %v3010_v49 = vld [vmem:[%s4233_s6] sm:$0xff] }
 0x1e1   : > { %v965_v63 = vpop.f32.mrf.mxu1  ;;  %1452 = vmatpush.bf16.msrb.mxu3 %v3012_v59  ;;  %1621 = vmatpush.bf16.msrb.mxu0 %v3012_v59  ;;  %v1163_v2 = vunpack.c.h.bf16 %v1065_v23 }
 0x1e2   : > { %v1208_v0 = vpack.c.bf16 %v1187_v62, %v1186_v61  ;;  %v966_v1 = vadd.f32 %v3570_v51, %v965_v63  ;;  %v3675_v61 = vpop.f32.mrf.mxu2 }
 0x1e4   : > { %1336 = vmatmul.bf16.gmra.mxu2 %v1208_v0  ;;  %v1092_v8 = vpack.c.bf16 %v966_v1, %v966_v1  ;;  %v3011_v0 = vld [vmem:[%s4233_s6 + $0x8] sm:$0xff]  ;;  %v1162_v1 = vunpack.c.l.bf16 %v1065_v23 }
 0x1e5   : > { %1453 = vmatpush.bf16.msrb.mxu3 %v3011_v0  ;;  %1622 = vmatpush.bf16.msrb.mxu0 %v3011_v0 }
 0x1e6   : > { %v1124_v13 = vunpack.c.l.bf16 %v1092_v8 }
 0x1e8   : > { %v1188_v17 = vmul.f32 %v1156_v14, %v1124_v13 }
 0x1e9   : > { %v967_v3 = vpop.f32.mrf.mxu1  ;;  %1454 = vmatpush.bf16.msrb.mxu3 %v3010_v49  ;;  %1623 = vmatpush.bf16.msrb.mxu0 %v3010_v49 }
 0x1ea   : > { %v968_v12 = vadd.f32 %v3570_v51, %v967_v3 }
 0x1ec   : > { %v1093_v7 = vpack.c.bf16 %v968_v12, %v968_v12 }
 0x1ee   : > { %v1125_v16 = vunpack.c.l.bf16 %v1093_v7 }
 0x1f0   : > { %v1189_v18 = vmul.f32 %v1157_v15, %v1125_v16  ;;  %v3684_v15 = vpop.f32.mrf.mxu2 }
 0x1f1   : > { %v970_v20 = vpop.f32.mrf.mxu1 }
 0x1f2   : > { %v1209_v19 = vpack.c.bf16 %v1189_v18, %v1188_v17  ;;  %v971_v5 = vadd.f32 %v3570_v51, %v970_v20  ;;  %v1068_v17 = vsel %vm647_vm0, %v3517_v58, %v3630_v41  ;;  %v1383_v58 = vpack.c.bf16 %v3646_v35, %v3643_v26 }
 0x1f3   : > { %v1384_v41 = vpack.c.bf16 %v3684_v15, %v3675_v61 }
 0x1f4   : > { %1341 = vmatmul.bf16.gmra.mxu2 %v1209_v19  ;;  %v1094_v24 = vpack.c.bf16 %v971_v5, %v971_v5  ;;  %v1164_v19 = vunpack.c.l.bf16 %v1068_v17  ;;  %v1165_v5 = vunpack.c.h.bf16 %v1068_v17 }
 0x1f6   : > { %v1126_v28 = vunpack.c.l.bf16 %v1094_v24 }
 0x1f8   : > { %v1190_v10 = vmul.f32 %v1158_v29, %v1126_v28  ;;  %v3691_v46 = vpop.f32.mrf.mxu2 }
 0x1f9   : > { %v972_v25 = vpop.f32.mrf.mxu1 }
 0x1fa   : > { %v973_v27 = vadd.f32 %v3570_v51, %v972_v25 }
 0x1fc   : > { %v1095_v32 = vpack.c.bf16 %v973_v27, %v973_v27 }
 0x1fe   : > { %v1127_v33 = vunpack.c.l.bf16 %v1095_v32 }
 0x200   : > { %v1191_v34 = vmul.f32 %v1159_v31, %v1127_v33  ;;  %v3693_v31 = vpop.f32.mrf.mxu2 }
 0x202   : > { %v1210_v21 = vpack.c.bf16 %v1191_v34, %v1190_v10  ;;  %v1385_v34 = vpack.c.bf16 %v3693_v31, %v3691_v46 }
 0x204   : > { %1346 = vmatmul.bf16.gmra.mxu2 %v1210_v21 }
 0x207   : > { %v975_v36 = vpop.f32.mrf.mxu3 }
 0x208   : > { %v976_v37 = vadd.f32 %v3570_v51, %v975_v36  ;;  %v3695_v32 = vpop.f32.mrf.mxu2 }
 0x20a   : > { %v1096_v40 = vpack.c.bf16 %v976_v37, %v976_v37 }
 0x20c   : > { %v1128_v50 = vunpack.c.l.bf16 %v1096_v40 }
 0x20e   : > { %v1192_v47 = vmul.f32 %v1160_v45, %v1128_v50 }
 0x20f   : > { %v977_v42 = vpop.f32.mrf.mxu3 }
 0x210   : > { %v978_v43 = vadd.f32 %v3570_v51, %v977_v42 }
 0x212   : > { %v1097_v52 = vpack.c.bf16 %v978_v43, %v978_v43 }
 0x214   : > { %v1129_v53 = vunpack.c.l.bf16 %v1097_v52 }
 0x216   : > { %v1193_v30 = vmul.f32 %v1161_v6, %v1129_v53 }
 0x217   : > { %v980_v54 = vpop.f32.mrf.mxu3 }
 0x218   : > { %v1211_v55 = vpack.c.bf16 %v1193_v30, %v1192_v47  ;;  %v981_v11 = vadd.f32 %v3570_v51, %v980_v54 }
 0x21a   : > { %1351 = vmatmul.bf16.vlgmr.msra.gmra.mxu3 %v1211_v55  ;;  %v1098_v60 = vpack.c.bf16 %v981_v11, %v981_v11 }
 0x21c   : > { %v1130_v8 = vunpack.c.l.bf16 %v1098_v60 }
 0x21e   : > { %v1194_v4 = vmul.f32 %v1162_v1, %v1130_v8 }
 0x21f   : > { %v982_v62 = vpop.f32.mrf.mxu3 }
 0x220   : > { %v983_v63 = vadd.f32 %v3570_v51, %v982_v62 }
 0x222   : > { %v1099_v38 = vpack.c.bf16 %v983_v63, %v983_v63 }
 0x224   : > { %v1131_v3 = vunpack.c.l.bf16 %v1099_v38 }
 0x226   : > { %v1195_v12 = vmul.f32 %v1163_v2, %v1131_v3 }
 0x227   : > { %v985_v13 = vpop.f32.mrf.mxu3 }
 0x228   : > { %v1212_v14 = vpack.c.bf16 %v1195_v12, %v1194_v4  ;;  %v986_v7 = vadd.f32 %v3570_v51, %v985_v13 }
 0x22a   : > { %1356 = vmatmul.bf16.gmra.mxu3 %v1212_v14  ;;  %v1100_v16 = vpack.c.bf16 %v986_v7, %v986_v7 }
 0x22c   : > { %v1132_v22 = vunpack.c.l.bf16 %v1100_v16 }
 0x22e   : > { %v1196_v27 = vmul.f32 %v1164_v19, %v1132_v22 }
 0x22f   : > { %v987_v18 = vpop.f32.mrf.mxu3 }
 0x230   : > { %v988_v20 = vadd.f32 %v3570_v51, %v987_v18  ;;  %v3699_v51 = vpop.f32.mrf.mxu2 }
 0x231   : > { %v1386_v36 = vpack.c.bf16 %v3699_v51, %v3695_v32 }
 0x232   : > { %v1101_v24 = vpack.c.bf16 %v988_v20, %v988_v20 }
 0x234   : > { %v1133_v25 = vunpack.c.l.bf16 %v1101_v24 }
 0x236   : > { %v1197_v28 = vmul.f32 %v1165_v5, %v1133_v25 }
 0x238   : > { %v1213_v29 = vpack.c.bf16 %v1197_v28, %v1196_v27  ;;  %v3703_v33 = vpop.f32.mrf.mxu2 }
 0x23a   : > { %1361 = vmatmul.bf16.gmra.mxu3 %v1213_v29 }
 0x240   : > { %v3705_v10 = vpop.f32.mrf.mxu2 }
 0x241   : > { %v1387_v39 = vpack.c.bf16 %v3705_v10, %v3703_v33 }
 0x248   : > { %v3709_v21 = vpop.f32.mrf.mxu2 }
 0x24a   : > { %1455 = vmatmul.bf16.vlgmr.msrb.gmra.mxu3 %v1383_v58 }
 0x250   : > { %v3713_v56 = vpop.f32.mrf.mxu2 }
 0x251   : > { %v1388_v42 = vpack.c.bf16 %v3713_v56, %v3709_v21 }
 0x258   : > { %v3715_v37 = vpop.f32.mrf.mxu2 }
 0x25a   : > { %1460 = vmatmul.bf16.gmra.mxu3 %v1384_v41 }
 0x260   : > { %v3719_v40 = vpop.f32.mrf.mxu2 }
 0x261   : > { %v1389_v6 = vpack.c.bf16 %v3719_v40, %v3715_v37 }
 0x268   : > { %v3721_v9 = vpop.f32.mrf.mxu2 }
 0x26a   : > { %1465 = vmatmul.bf16.gmra.mxu3 %v1385_v34 }
 0x270   : > { %v3727_v44 = vpop.f32.mrf.mxu2 }
 0x271   : > { %v1390_v47 = vpack.c.bf16 %v3727_v44, %v3721_v9 }
 0x278   : > { %v3733_v50 = vpop.f32.mrf.mxu2 }
 0x27a   : > { %1470 = vmatmul.bf16.gmra.mxu3 %v1386_v36 }
 0x280   : > { %v3737_v53 = vpop.f32.mrf.mxu2 }
 0x281   : > { %v1391_v57 = vpack.c.bf16 %v3737_v53, %v3733_v50 }
 0x288   : > { %v3745_v54 = vpop.f32.mrf.mxu2 }
 0x28a   : > { %1475 = vmatmul.bf16.gmra.mxu3 %v1387_v39 }
 0x290   : > { %v3751_v11 = vpop.f32.mrf.mxu2 }
 0x291   : > { %v1392_v0 = vpack.c.bf16 %v3751_v11, %v3745_v54 }
 0x298   : > { %v3753_v60 = vpop.f32.mrf.mxu2 }
 0x29a   : > { %1480 = vmatmul.bf16.gmra.mxu3 %v1388_v42 }
 0x29d   : > { %v3725_v43 = vpop.f32.mrf.mxu3 }
 0x2a0   : > { %v3767_v38 = vpop.f32.mrf.mxu2 }
 0x2a1   : > { %v1393_v13 = vpack.c.bf16 %v3767_v38, %v3753_v60 }
 0x2a5   : > { %v3729_v45 = vpop.f32.mrf.mxu3 }
 0x2a8   : > { %v3778_v12 = vpop.f32.mrf.mxu2 }
 0x2aa   : > { %1485 = vmatmul.bf16.gmra.mxu3 %v1389_v6 }
 0x2ad   : > { %v3735_v52 = vpop.f32.mrf.mxu3 }
 0x2b0   : > { %v3786_v17 = vpop.f32.mrf.mxu2 }
 0x2b1   : > { %v1394_v19 = vpack.c.bf16 %v3786_v17, %v3778_v12 }
 0x2b5   : > { %v3739_v48 = vpop.f32.mrf.mxu3 }
 0x2b8   : > { %v3803_v25 = vpop.f32.mrf.mxu2 }
 0x2ba   : > { %1490 = vmatmul.bf16.gmra.mxu3 %v1390_v47  ;;  %v1396_v47 = vpack.c.bf16 %v3729_v45, %v3725_v43 }
 0x2bd   : > { %v3743_v30 = vpop.f32.mrf.mxu3 }
 0x2c0   : > { %v3808_v29 = vpop.f32.mrf.mxu2 }
 0x2c1   : > { %v1395_v41 = vpack.c.bf16 %v3808_v29, %v3803_v25 }
 0x2c5   : > { %v3747_v55 = vpop.f32.mrf.mxu3 }
 0x2ca   : > { %1495 = vmatmul.bf16.gmra.mxu3 %v1391_v57 }
 0x2cd   : > { %v1456_v59 = vpop.f32.mrf.mxu3 }
 0x2ce   : > { %v3756_v23 = vsub.f32 %v3643_v26, %v1456_v59 }
 0x2d0   : > { %v1568_v1 = vmul.f32 %v3756_v23, %v3756_v23 }
 0x2d5   : > { %v1458_v62 = vpop.f32.mrf.mxu3 }
 0x2d6   : > { %v3759_v63 = vsub.f32 %v3646_v35, %v1458_v62  ;;  %v3025_v35 = vld [vmem:[%s4236_s9 + $0x38] sm:$0xff]  ;;  %v3023_v62 = vld [vmem:[%s4236_s9 + $0x28] sm:$0xff] }
 0x2d7   : > { %2245 = vmatpush.bf16.msrb.mxu1 %v3025_v35 }
 0x2d8   : > { %v1569_v2 = vmul.f32 %v3759_v63, %v3759_v63 }
 0x2da   : > { %v1600_v8 = vpack.c.bf16 %v1569_v2, %v1568_v1  ;;  %1500 = vmatmul.bf16.gmra.mxu3 %v1392_v0 }
 0x2dc   : > { %1624 = vmatmul.bf16.vlgmr.msrb.gmra.mxu0 %v1600_v8  ;;  %v1397_v8 = vpack.c.bf16 %v3739_v48, %v3735_v52 }
 0x2dd   : > { %v1461_v26 = vpop.f32.mrf.mxu3 }
 0x2de   : > { %v3773_v3 = vsub.f32 %v3675_v61, %v1461_v26 }
 0x2e0   : > { %v1570_v14 = vmul.f32 %v3773_v3, %v3773_v3 }
 0x2e5   : > { %v1463_v49 = vpop.f32.mrf.mxu3 }
 0x2e6   : > { %v3776_v4 = vsub.f32 %v3684_v15, %v1463_v49 }
 0x2e8   : > { %v1571_v7 = vmul.f32 %v3776_v4, %v3776_v4 }
 0x2ea   : > { %1505 = vmatmul.bf16.gmra.mxu3 %v1393_v13  ;;  %v1601_v16 = vpack.c.bf16 %v1571_v7, %v1570_v14 }
 0x2ec   : > { %1629 = vmatmul.bf16.gmra.mxu0 %v1601_v16  ;;  %v1398_v16 = vpack.c.bf16 %v3747_v55, %v3743_v30 }
 0x2ed   : > { %v1466_v61 = vpop.f32.mrf.mxu3 }
 0x2ee   : > { %v3789_v15 = vsub.f32 %v3691_v46, %v1466_v61  ;;  %v3024_v46 = vld [vmem:[%s4236_s9 + $0x30] sm:$0xff] }
 0x2ef   : > { %2246 = vmatpush.bf16.msrb.mxu1 %v3024_v46 }
 0x2f0   : > { %v1572_v5 = vmul.f32 %v3789_v15, %v3789_v15 }
 0x2f3   : > { %2247 = vmatpush.bf16.msrb.mxu1 %v3023_v62 }
 0x2f5   : > { %v1468_v18 = vpop.f32.mrf.mxu3 }
 0x2f6   : > { %v3792_v20 = vsub.f32 %v3693_v31, %v1468_v18 }
 0x2f8   : > { %v1573_v22 = vmul.f32 %v3792_v20, %v3792_v20 }
 0x2fa   : > { %1510 = vmatmul.bf16.gmra.mxu3 %v1394_v19  ;;  %v1602_v24 = vpack.c.bf16 %v1573_v22, %v1572_v5 }
 0x2fc   : > { %1634 = vmatmul.bf16.gmra.mxu0 %v1602_v24 }
 0x2fd   : > { %v1471_v27 = vpop.f32.mrf.mxu3 }
 0x2fe   : > { %v3806_v28 = vsub.f32 %v3695_v32, %v1471_v27 }
 0x300   : > { %v1574_v34 = vmul.f32 %v3806_v28, %v3806_v28 }
 0x305   : > { %v1473_v31 = vpop.f32.mrf.mxu3 }
 0x306   : > { %v3811_v58 = vsub.f32 %v3699_v51, %v1473_v31 }
 0x308   : > { %v1575_v36 = vmul.f32 %v3811_v58, %v3811_v58 }
 0x30a   : > { %1515 = vmatmul.bf16.gmra.mxu3 %v1395_v41  ;;  %v1603_v39 = vpack.c.bf16 %v1575_v36, %v1574_v34  ;;  %v3021_v41 = vld [vmem:[%s4236_s9 + $0x18] sm:$0xff] }
 0x30c   : > { %1639 = vmatmul.bf16.gmra.mxu0 %v1603_v39  ;;  %v3019_v39 = vld [vmem:[%s4236_s9 + $0x8] sm:$0xff] }
 0x30d   : > { %v1476_v32 = vpop.f32.mrf.mxu3 }
 0x30e   : > { %v3820_v42 = vsub.f32 %v3703_v33, %v1476_v32 }
 0x310   : > { %v1576_v57 = vmul.f32 %v3820_v42, %v3820_v42 }
 0x315   : > { %v1478_v6 = vpop.f32.mrf.mxu3 }
 0x316   : > { %v3823_v51 = vsub.f32 %v3705_v10, %v1478_v6 }
 0x318   : > { %v1577_v59 = vmul.f32 %v3823_v51, %v3823_v51 }
 0x31a   : > { %1520 = vmatmul.bf16.gmra.mxu3 %v1396_v47  ;;  %v1604_v33 = vpack.c.bf16 %v1577_v59, %v1576_v57  ;;  %v3018_v59 = vld [vmem:[%s4236_s9] sm:$0xff] }
 0x31c   : > { %1644 = vmatmul.bf16.gmra.mxu0 %v1604_v33 }
 0x31d   : > { %v1481_v0 = vpop.f32.mrf.mxu3 }
 0x31e   : > { %v3835_v10 = vsub.f32 %v3709_v21, %v1481_v0  ;;  %v3022_v21 = vld [vmem:[%s4236_s9 + $0x20] sm:$0xff] }
 0x31f   : > { %2248 = vmatpush.bf16.msrb.mxu1 %v3022_v21 }
 0x320   : > { %v1578_v26 = vmul.f32 %v3835_v10, %v3835_v10 }
 0x323   : > { %2249 = vmatpush.bf16.msrb.mxu1 %v3021_v41  ;;  %v3907_v41 = vld [vmem:[%s4234_s7] ss:$0 sm:$0xff] }
 0x325   : > { %v1483_v1 = vpop.f32.mrf.mxu3 }
 0x326   : > { %v3838_v2 = vsub.f32 %v3713_v56, %v1483_v1 }
 0x328   : > { %v1579_v35 = vmul.f32 %v3838_v2, %v3838_v2 }
 0x32a   : > { %1525 = vmatmul.bf16.gmra.mxu3 %v1397_v8  ;;  %v1605_v49 = vpack.c.bf16 %v1579_v35, %v1578_v26 }
 0x32c   : > { %1649 = vmatmul.bf16.gmra.mxu0 %v1605_v49 }
 0x32d   : > { %v1486_v13 = vpop.f32.mrf.mxu3 }
 0x32e   : > { %v3850_v56 = vsub.f32 %v3715_v37, %v1486_v13 }
 0x330   : > { %v1580_v61 = vmul.f32 %v3850_v56, %v3850_v56 }
 0x335   : > { %v1488_v14 = vpop.f32.mrf.mxu3 }
 0x336   : > { %v3853_v7 = vsub.f32 %v3719_v40, %v1488_v14 }
 0x338   : > { %v1581_v18 = vmul.f32 %v3853_v7, %v3853_v7 }
 0x33a   : > { %1530 = vmatmul.bf16.gmra.mxu3 %v1398_v16  ;;  %v1606_v19 = vpack.c.bf16 %v1581_v18, %v1580_v61 }
 0x33c   : > { %1654 = vmatmul.bf16.gmra.mxu0 %v1606_v19 }
 0x33d   : > { %v1491_v5 = vpop.f32.mrf.mxu3 }
 0x33e   : > { %v3862_v37 = vsub.f32 %v3721_v9, %v1491_v5  ;;  %v3020_v9 = vld [vmem:[%s4236_s9 + $0x10] sm:$0xff] }
 0x33f   : > { %2250 = vmatpush.bf16.msrb.mxu1 %v3020_v9 }
 0x340   : > { %v1582_v24 = vmul.f32 %v3862_v37, %v3862_v37 }
 0x343   : > { %2251 = vmatpush.bf16.msrb.mxu1 %v3019_v39 }
 0x345   : > { %v1493_v22 = vpop.f32.mrf.mxu3 }
 0x346   : > { %v3865_v40 = vsub.f32 %v3727_v44, %v1493_v22 }
 0x347   : > { %2252 = vmatpush.bf16.msrb.mxu1 %v3018_v59 }
 0x348   : > { %v1583_v46 = vmul.f32 %v3865_v40, %v3865_v40 }
 0x34a   : > { %v1607_v27 = vpack.c.bf16 %v1583_v46, %v1582_v24 }
 0x34c   : > { %1659 = vmatmul.bf16.gmra.mxu0 %v1607_v27 }
 0x34d   : > { %v1496_v31 = vpop.f32.mrf.mxu3 }
 0x34e   : > { %v3878_v44 = vsub.f32 %v3733_v50, %v1496_v31 }
 0x350   : > { %v1584_v32 = vmul.f32 %v3878_v44, %v3878_v44 }
 0x355   : > { %v1498_v34 = vpop.f32.mrf.mxu3 }
 0x356   : > { %v3881_v36 = vsub.f32 %v3737_v53, %v1498_v34 }
 0x358   : > { %v1585_v6 = vmul.f32 %v3881_v36, %v3881_v36 }
 0x359   : > { %v1625_v47 = vpop.f32.mrf.mxu0 }
 0x35a   : > { %v1626_v57 = vadd.f32 1e-05, %v1625_v47  ;;  %v1608_v50 = vpack.c.bf16 %v1585_v6, %v1584_v32 }
 0x35c   : > { %3103 = vrsqrt.f32 %v1626_v57  ;;  %1664 = vmatmul.bf16.gmra.mxu0 %v1608_v50  ;;  %vm1711_vm2 = vweird.f32 %v1626_v57 }
 0x35d   : > { %v1501_v53 = vpop.f32.mrf.mxu3 }
 0x35e   : > { %v3894_v8 = vsub.f32 %v3745_v54, %v1501_v53 }
 0x360   : > { %v1586_v21 = vmul.f32 %v3894_v8, %v3894_v8 }
 0x361   : > { %v1627_v62 = vpop.f32.mrf.mxu0 }
 0x362   : > { %v3104_v33 = vpop.eup %3103  ;;  %v1628_v0 = vadd.f32 1e-05, %v1627_v62 }
 0x363   : > { %v1706_v1 = vmul.f32 %v3104_v33, %v1626_v57  ;;  %vm1712_vm1 = vweird.f32 %v3104_v33 }
 0x364   : > { %3105 = vrsqrt.f32 %v1628_v0  ;;  %vm1713_vm3 = vmor %vm1711_vm2, %vm1712_vm1  ;;  %vm1721_vm5 = vweird.f32 %v1628_v0 }
 0x365   : > { %v1707_v26 = vmul.f32 %v3104_v33, %v1706_v1  ;;  %v1503_v35 = vpop.f32.mrf.mxu3 }
 0x366   : > { %v3897_v49 = vsub.f32 %v3751_v11, %v1503_v35 }
 0x367   : > { %v1708_v13 = vmul.f32 0.5, %v1707_v26 }
 0x368   : > { %v1587_v14 = vmul.f32 %v3897_v49, %v3897_v49 }
 0x369   : > { %v1709_v16 = vsub.f32 1.5, %v1708_v13  ;;  %v1630_v61 = vpop.f32.mrf.mxu0 }
 0x36a   : > { %v3106_v18 = vpop.eup %3105  ;;  %v1631_v19 = vadd.f32 1e-05, %v1630_v61  ;;  %v1609_v54 = vpack.c.bf16 %v1587_v14, %v1586_v21 }
 0x36b   : > { %v1710_v5 = vmul.f32 %v3104_v33, %v1709_v16  ;;  %v1716_v22 = vmul.f32 %v3106_v18, %v1628_v0  ;;  %vm1722_vm4 = vweird.f32 %v3106_v18 }
 0x36c   : > { %3107 = vrsqrt.f32 %v1631_v19  ;;  %1669 = vmatmul.bf16.gmra.mxu0 %v1609_v54  ;;  %vm1723_vm6 = vmor %vm1721_vm5, %vm1722_vm4  ;;  %vm1731_vm8 = vweird.f32 %v1631_v19 }
 0x36d   : > { %v1714_v11 = vsel %vm1713_vm3, %v3104_v33, %v1710_v5  ;;  %v1717_v24 = vmul.f32 %v3106_v18, %v1716_v22  ;;  %v1506_v46 = vpop.f32.mrf.mxu3 }
 0x36e   : > { %v2025_v31 = vmul.f32 %v1714_v11, %v3756_v23  ;;  %v3911_v50 = vsub.f32 %v3753_v60, %v1506_v46  ;;  %v3916_v23 = vld [vmem:[%s4235_s8] ss:$0 sm:$0xff] }
 0x36f   : > { %v1718_v27 = vmul.f32 0.5, %v1717_v24 }
 0x370   : > { %v2061_v57 = vmul.f32 %v3907_v41, %v2025_v31  ;;  %v1588_v26 = vmul.f32 %v3911_v50, %v3911_v50  ;;  %v3033_v31 = vld [vmem:[%s4238_s11 + $0x38] sm:$0xff] }
 0x371   : > { %v1719_v9 = vsub.f32 1.5, %v1718_v27  ;;  %v1632_v34 = vpop.f32.mrf.mxu0  ;;  %2450 = vmatpush.bf16.msrb.mxu2 %v3033_v31 }
 0x372   : > { %v3108_v39 = vpop.eup %3107  ;;  %v1633_v32 = vadd.f32 1e-05, %v1632_v34  ;;  %v2097_v13 = vadd.f32 %v3916_v23, %v2061_v57 }
 0x373   : > { %v1720_v6 = vmul.f32 %v3106_v18, %v1719_v9  ;;  %v1726_v47 = vmul.f32 %v3108_v39, %v1631_v19  ;;  %vm1732_vm7 = vweird.f32 %v3108_v39 }
 0x374   : > { %3109 = vrsqrt.f32 %v1633_v32  ;;  %vm1733_vm9 = vmor %vm1731_vm8, %vm1732_vm7  ;;  %v2129_v5 = vmax.f32 %v2097_v13, 0.0  ;;  %vm1741_vm11 = vweird.f32 %v1633_v32 }
 0x375   : > { %v1724_v59 = vsel %vm1723_vm6, %v3106_v18, %v1720_v6  ;;  %v1727_v53 = vmul.f32 %v3108_v39, %v1726_v47  ;;  %v1508_v62 = vpop.f32.mrf.mxu3 }
 0x376   : > { %v2026_v33 = vmul.f32 %v1724_v59, %v3759_v63  ;;  %v3920_v0 = vsub.f32 %v3767_v38, %v1508_v62 }
 0x377   : > { %v1728_v1 = vmul.f32 0.5, %v1727_v53 }
 0x378   : > { %v1589_v60 = vmul.f32 %v3920_v0, %v3920_v0  ;;  %v2062_v35 = vmul.f32 %v3907_v41, %v2026_v33 }
 0x379   : > { %v1729_v21 = vsub.f32 1.5, %v1728_v1  ;;  %v1635_v14 = vpop.f32.mrf.mxu0 }
 0x37a   : > { %v3110_v16 = vpop.eup %3109  ;;  %v1636_v61 = vadd.f32 1e-05, %v1635_v14  ;;  %v1610_v63 = vpack.c.bf16 %v1589_v60, %v1588_v26  ;;  %v2098_v38 = vadd.f32 %v3916_v23, %v2062_v35 }
 0x37b   : > { %v1730_v18 = vmul.f32 %v3108_v39, %v1729_v21  ;;  %v1736_v54 = vmul.f32 %v3110_v16, %v1633_v32  ;;  %vm1742_vm10 = vweird.f32 %v3110_v16 }
 0x37c   : > { %3111 = vrsqrt.f32 %v1636_v61  ;;  %1674 = vmatmul.bf16.gmra.mxu0 %v1610_v63  ;;  %v2130_v22 = vmax.f32 %v2098_v38, 0.0  ;;  %vm1743_vm12 = vmor %vm1741_vm11, %vm1742_vm10  ;;  %vm1751_vm14 = vweird.f32 %v1636_v61 }
 0x37d   : > { %v1734_v11 = vsel %vm1733_vm9, %v3108_v39, %v1730_v18  ;;  %v1737_v24 = vmul.f32 %v3110_v16, %v1736_v54  ;;  %v1511_v46 = vpop.f32.mrf.mxu3 }
 0x37e   : > { %v2178_v27 = vpack.c.bf16 %v2130_v22, %v2129_v5  ;;  %v2027_v34 = vmul.f32 %v1734_v11, %v3773_v3  ;;  %v3934_v53 = vsub.f32 %v3778_v12, %v1511_v46 }
 0x37f   : > { %v1738_v9 = vmul.f32 0.5, %v1737_v24 }
 0x380   : > { %2253 = vmatmul.bf16.vlgmr.msrb.gmra.mxu1 %v2178_v27  ;;  %v2063_v62 = vmul.f32 %v3907_v41, %v2027_v34  ;;  %v1590_v32 = vmul.f32 %v3934_v53, %v3934_v53 }
 0x381   : > { %v1739_v19 = vsub.f32 1.5, %v1738_v9  ;;  %v1637_v6 = vpop.f32.mrf.mxu0 }
 0x382   : > { %v3112_v47 = vpop.eup %3111  ;;  %v1638_v57 = vadd.f32 1e-05, %v1637_v6  ;;  %v2099_v21 = vadd.f32 %v3916_v23, %v2063_v62 }
 0x383   : > { %v1740_v59 = vmul.f32 %v3110_v16, %v1739_v19  ;;  %v1746_v39 = vmul.f32 %v3112_v47, %v1636_v61  ;;  %vm1752_vm13 = vweird.f32 %v3112_v47 }
 0x384   : > { %3113 = vrsqrt.f32 %v1638_v57  ;;  %vm1753_vm15 = vmor %vm1751_vm14, %vm1752_vm13  ;;  %v2131_v5 = vmax.f32 %v2099_v21, 0.0  ;;  %vm1761_vm1 = vweird.f32 %v1638_v57 }
 0x385   : > { %v1744_v33 = vsel %vm1743_vm12, %v3110_v16, %v1740_v59  ;;  %v1747_v1 = vmul.f32 %v3112_v47, %v1746_v39  ;;  %v1513_v3 = vpop.f32.mrf.mxu3 }
 0x386   : > { %v3938_v26 = vsub.f32 %v3786_v17, %v1513_v3  ;;  %v2028_v60 = vmul.f32 %v1744_v33, %v3776_v4 }
 0x387   : > { %v1748_v35 = vmul.f32 0.5, %v1747_v1 }
 0x388   : > { %v1591_v13 = vmul.f32 %v3938_v26, %v3938_v26  ;;  %v2064_v12 = vmul.f32 %v3907_v41, %v2028_v60 }
 0x389   : > { %v1749_v14 = vsub.f32 1.5, %v1748_v35  ;;  %v1640_v16 = vpop.f32.mrf.mxu0 }
 0x38a   : > { %v3114_v63 = vpop.eup %3113  ;;  %v1641_v38 = vadd.f32 1e-05, %v1640_v16  ;;  %v1611_v17 = vpack.c.bf16 %v1591_v13, %v1590_v32  ;;  %v2100_v18 = vadd.f32 %v3916_v23, %v2064_v12 }
 0x38b   : > { %v1750_v4 = vmul.f32 %v3112_v47, %v1749_v14  ;;  %v1756_v54 = vmul.f32 %v3114_v63, %v1638_v57  ;;  %vm1762_vm0 = vweird.f32 %v3114_v63  ;;  %v3032_v57 = vld [vmem:[%s4238_s11 + $0x30] sm:$0xff] }
 0x38c   : > { %3115 = vrsqrt.f32 %v1641_v38  ;;  %1679 = vmatmul.bf16.gmra.mxu0 %v1611_v17  ;;  %v2132_v22 = vmax.f32 %v2100_v18, 0.0  ;;  %vm1763_vm2 = vmor %vm1761_vm1, %vm1762_vm0  ;;  %2451 = vmatpush.bf16.msrb.mxu2 %v3032_v57  ;;  %vm1771_vm4 = vweird.f32 %v1641_v38 }
 0x38d   : > { %v1754_v11 = vsel %vm1753_vm15, %v3112_v47, %v1750_v4  ;;  %v1757_v24 = vmul.f32 %v3114_v63, %v1756_v54  ;;  %v1516_v46 = vpop.f32.mrf.mxu3 }
 0x38e   : > { %v2179_v27 = vpack.c.bf16 %v2132_v22, %v2131_v5  ;;  %v2029_v9 = vmul.f32 %v1754_v11, %v3789_v15  ;;  %v3950_v62 = vsub.f32 %v3803_v25, %v1516_v46 }
 0x38f   : > { %v1758_v31 = vmul.f32 0.5, %v1757_v24 }
 0x390   : > { %2258 = vmatmul.bf16.gmra.mxu1 %v2179_v27  ;;  %v2065_v47 = vmul.f32 %v3907_v41, %v2029_v9  ;;  %v1592_v25 = vmul.f32 %v3950_v62, %v3950_v62 }
 0x391   : > { %v1759_v34 = vsub.f32 1.5, %v1758_v31  ;;  %v1642_v19 = vpop.f32.mrf.mxu0 }
 0x392   : > { %v3116_v6 = vpop.eup %3115  ;;  %v1643_v59 = vadd.f32 1e-05, %v1642_v19  ;;  %v2101_v12 = vadd.f32 %v3916_v23, %v2065_v47 }
 0x393   : > { %v1760_v61 = vmul.f32 %v3114_v63, %v1759_v34  ;;  %v1766_v39 = vmul.f32 %v3116_v6, %v1641_v38  ;;  %vm1772_vm3 = vweird.f32 %v3116_v6 }
 0x394   : > { %3117 = vrsqrt.f32 %v1643_v59  ;;  %vm1773_vm5 = vmor %vm1771_vm4, %vm1772_vm3  ;;  %v2133_v4 = vmax.f32 %v2101_v12, 0.0  ;;  %vm1781_vm7 = vweird.f32 %v1643_v59 }
 0x395   : > { %v1764_v33 = vsel %vm1763_vm2, %v3114_v63, %v1760_v61  ;;  %v1767_v1 = vmul.f32 %v3116_v6, %v1766_v39  ;;  %v1518_v3 = vpop.f32.mrf.mxu3 }
 0x396   : > { %v3954_v15 = vsub.f32 %v3808_v29, %v1518_v3  ;;  %v2030_v60 = vmul.f32 %v1764_v33, %v3792_v20 }
 0x397   : > { %v1768_v35 = vmul.f32 0.5, %v1767_v1 }
 0x398   : > { %v1593_v32 = vmul.f32 %v3954_v15, %v3954_v15  ;;  %v2066_v13 = vmul.f32 %v3907_v41, %v2030_v60 }
 0x399   : > { %v1769_v29 = vsub.f32 1.5, %v1768_v35  ;;  %v1645_v21 = vpop.f32.mrf.mxu0 }
 0x39a   : > { %v3118_v20 = vpop.eup %3117  ;;  %v1646_v14 = vadd.f32 1e-05, %v1645_v21  ;;  %v1612_v16 = vpack.c.bf16 %v1593_v32, %v1592_v25  ;;  %v2102_v63 = vadd.f32 %v3916_v23, %v2066_v13 }
 0x39b   : > { %v1770_v17 = vmul.f32 %v3116_v6, %v1769_v29  ;;  %v1776_v18 = vmul.f32 %v3118_v20, %v1643_v59  ;;  %vm1782_vm6 = vweird.f32 %v3118_v20 }
 0x39c   : > { %3119 = vrsqrt.f32 %v1646_v14  ;;  %1684 = vmatmul.bf16.gmra.mxu0 %v1612_v16  ;;  %v2134_v54 = vmax.f32 %v2102_v63, 0.0  ;;  %vm1783_vm8 = vmor %vm1781_vm7, %vm1782_vm6  ;;  %vm1791_vm10 = vweird.f32 %v1646_v14 }
 0x39d   : > { %v1774_v5 = vsel %vm1773_vm5, %v3116_v6, %v1770_v17  ;;  %v1777_v22 = vmul.f32 %v3118_v20, %v1776_v18  ;;  %v1521_v11 = vpop.f32.mrf.mxu3 }
 0x39e   : > { %v2180_v24 = vpack.c.bf16 %v2134_v54, %v2133_v4  ;;  %v2031_v27 = vmul.f32 %v1774_v5, %v3806_v28  ;;  %v3969_v39 = vsub.f32 %v3725_v43, %v1521_v11 }
 0x39f   : > { %v1778_v46 = vmul.f32 0.5, %v1777_v22 }
 0x3a0   : > { %2263 = vmatmul.bf16.gmra.mxu1 %v2180_v24  ;;  %v2067_v6 = vmul.f32 %v3907_v41, %v2031_v27  ;;  %v1594_v59 = vmul.f32 %v3969_v39, %v3969_v39 }
 0x3a1   : > { %v1779_v31 = vsub.f32 1.5, %v1778_v46  ;;  %v1647_v9 = vpop.f32.mrf.mxu0 }
 0x3a2   : > { %v3120_v34 = vpop.eup %3119  ;;  %v1648_v19 = vadd.f32 1e-05, %v1647_v9  ;;  %v2103_v35 = vadd.f32 %v3916_v23, %v2067_v6 }
 0x3a3   : > { %v1780_v38 = vmul.f32 %v3118_v20, %v1779_v31  ;;  %v1786_v61 = vmul.f32 %v3120_v34, %v1646_v14  ;;  %vm1792_vm9 = vweird.f32 %v3120_v34 }
 0x3a4   : > { %3121 = vrsqrt.f32 %v1648_v19  ;;  %vm1793_vm11 = vmor %vm1791_vm10, %vm1792_vm9  ;;  %vm1801_vm13 = vweird.f32 %v1648_v19 }
 0x3a5   : > { %v1784_v47 = vsel %vm1783_vm8, %v3118_v20, %v1780_v38  ;;  %v1787_v33 = vmul.f32 %v3120_v34, %v1786_v61  ;;  %v1523_v1 = vpop.f32.mrf.mxu3  ;;  %v2135_v20 = vmax.f32 %v2103_v35, 0.0 }
 0x3a6   : > { %v3973_v28 = vsub.f32 %v3729_v45, %v1523_v1  ;;  %v2032_v3 = vmul.f32 %v1784_v47, %v3811_v58 }
 0x3a7   : > { %v1788_v60 = vmul.f32 0.5, %v1787_v33 }
 0x3a8   : > { %v1595_v57 = vmul.f32 %v3973_v28, %v3973_v28  ;;  %v2068_v43 = vmul.f32 %v3907_v41, %v2032_v3 }
 0x3a9   : > { %v1789_v25 = vsub.f32 1.5, %v1788_v60  ;;  %v1650_v32 = vpop.f32.mrf.mxu0 }
 0x3aa   : > { %v3122_v13 = vpop.eup %3121  ;;  %v1651_v12 = vadd.f32 1e-05, %v1650_v32  ;;  %v1613_v45 = vpack.c.bf16 %v1595_v57, %v1594_v59  ;;  %v2104_v29 = vadd.f32 %v3916_v23, %v2068_v43 }
 0x3ab   : > { %v1790_v58 = vmul.f32 %v3120_v34, %v1789_v25  ;;  %v1796_v21 = vmul.f32 %v3122_v13, %v1648_v19  ;;  %vm1802_vm12 = vweird.f32 %v3122_v13  ;;  %v3031_v19 = vld [vmem:[%s4238_s11 + $0x28] sm:$0xff] }
 0x3ac   : > { %3123 = vrsqrt.f32 %v1651_v12  ;;  %1689 = vmatmul.bf16.gmra.mxu0 %v1613_v45  ;;  %v2136_v16 = vmax.f32 %v2104_v29, 0.0  ;;  %vm1803_vm14 = vmor %vm1801_vm13, %vm1802_vm12  ;;  %2452 = vmatpush.bf16.msrb.mxu2 %v3031_v19  ;;  %vm1811_vm0 = vweird.f32 %v1651_v12 }
 0x3ad   : > { %v1794_v63 = vsel %vm1793_vm11, %v3120_v34, %v1790_v58  ;;  %v1797_v17 = vmul.f32 %v3122_v13, %v1796_v21  ;;  %v1526_v18 = vpop.f32.mrf.mxu3 }
 0x3ae   : > { %v2181_v4 = vpack.c.bf16 %v2136_v16, %v2135_v20  ;;  %v2033_v5 = vmul.f32 %v1794_v63, %v3820_v42  ;;  %v3985_v31 = vsub.f32 %v3735_v52, %v1526_v18 }
 0x3af   : > { %v1798_v54 = vmul.f32 0.5, %v1797_v17 }
 0x3b0   : > { %2268 = vmatmul.bf16.gmra.mxu1 %v2181_v4  ;;  %v2069_v9 = vmul.f32 %v3907_v41, %v2033_v5  ;;  %v1596_v52 = vmul.f32 %v3985_v31, %v3985_v31 }
 0x3b1   : > { %v1799_v22 = vsub.f32 1.5, %v1798_v54  ;;  %v1652_v11 = vpop.f32.mrf.mxu0 }
 0x3b2   : > { %v3124_v24 = vpop.eup %3123  ;;  %v1653_v46 = vadd.f32 1e-05, %v1652_v11  ;;  %v2105_v3 = vadd.f32 %v3916_v23, %v2069_v9 }
 0x3b3   : > { %v1800_v14 = vmul.f32 %v3122_v13, %v1799_v22  ;;  %v1806_v27 = vmul.f32 %v3124_v24, %v1651_v12  ;;  %vm1812_vm15 = vweird.f32 %v3124_v24 }
 0x3b4   : > { %3125 = vrsqrt.f32 %v1653_v46  ;;  %vm1813_vm1 = vmor %vm1811_vm0, %vm1812_vm15  ;;  %v2137_v32 = vmax.f32 %v2105_v3, 0.0  ;;  %vm1821_vm3 = vweird.f32 %v1653_v46 }
 0x3b5   : > { %v1804_v34 = vsel %vm1803_vm14, %v3122_v13, %v1800_v14  ;;  %v1807_v38 = vmul.f32 %v3124_v24, %v1806_v27  ;;  %v1528_v61 = vpop.f32.mrf.mxu3 }
 0x3b6   : > { %v2034_v42 = vmul.f32 %v1804_v34, %v3823_v51  ;;  %v3990_v6 = vsub.f32 %v3739_v48, %v1528_v61 }
 0x3b7   : > { %v1808_v47 = vmul.f32 0.5, %v1807_v38 }
 0x3b8   : > { %v1597_v33 = vmul.f32 %v3990_v6, %v3990_v6  ;;  %v2070_v1 = vmul.f32 %v3907_v41, %v2034_v42 }
 0x3b9   : > { %v1809_v51 = vsub.f32 1.5, %v1808_v47  ;;  %v1655_v48 = vpop.f32.mrf.mxu0 }
 0x3ba   : > { %v3126_v60 = vpop.eup %3125  ;;  %v1656_v59 = vadd.f32 1e-05, %v1655_v48  ;;  %v1614_v57 = vpack.c.bf16 %v1597_v33, %v1596_v52  ;;  %v2106_v43 = vadd.f32 %v3916_v23, %v2070_v1 }
 0x3bb   : > { %v1810_v35 = vmul.f32 %v3124_v24, %v1809_v51  ;;  %v1816_v25 = vmul.f32 %v3126_v60, %v1653_v46  ;;  %vm1822_vm2 = vweird.f32 %v3126_v60 }
 0x3bc   : > { %3127 = vrsqrt.f32 %v1656_v59  ;;  %1694 = vmatmul.bf16.gmra.mxu0 %v1614_v57  ;;  %v2138_v13 = vmax.f32 %v2106_v43, 0.0  ;;  %vm1823_vm4 = vmor %vm1821_vm3, %vm1822_vm2  ;;  %vm1831_vm6 = vweird.f32 %v1656_v59  ;;  %v3030_v57 = vld [vmem:[%s4238_s11 + $0x20] sm:$0xff] }
 0x3bd   : > { %v1814_v45 = vsel %vm1813_vm1, %v3124_v24, %v1810_v35  ;;  %v1817_v29 = vmul.f32 %v3126_v60, %v1816_v25  ;;  %v1531_v58 = vpop.f32.mrf.mxu3  ;;  %2453 = vmatpush.bf16.msrb.mxu2 %v3030_v57 }
 0x3be   : > { %v2182_v21 = vpack.c.bf16 %v2138_v13, %v2137_v32  ;;  %v2035_v16 = vmul.f32 %v1814_v45, %v3835_v10  ;;  %v4004_v5 = vsub.f32 %v3743_v30, %v1531_v58 }
 0x3bf   : > { %v1818_v20 = vmul.f32 0.5, %v1817_v29 }
 0x3c0   : > { %2273 = vmatmul.bf16.gmra.mxu1 %v2182_v21  ;;  %v2071_v22 = vmul.f32 %v3907_v41, %v2035_v16  ;;  %v1598_v46 = vmul.f32 %v4004_v5, %v4004_v5 }
 0x3c1   : > { %v1819_v63 = vsub.f32 1.5, %v1818_v20  ;;  %v1657_v17 = vpop.f32.mrf.mxu0 }
 0x3c2   : > { %v3128_v18 = vpop.eup %3127  ;;  %v1658_v4 = vadd.f32 1e-05, %v1657_v17  ;;  %v2107_v38 = vadd.f32 %v3916_v23, %v2071_v22 }
 0x3c3   : > { %v1820_v12 = vmul.f32 %v3126_v60, %v1819_v63  ;;  %v1826_v54 = vmul.f32 %v3128_v18, %v1656_v59  ;;  %vm1832_vm5 = vweird.f32 %v3128_v18 }
 0x3c4   : > { %3129 = vrsqrt.f32 %v1658_v4  ;;  %vm1833_vm7 = vmor %vm1831_vm6, %vm1832_vm5  ;;  %v2139_v1 = vmax.f32 %v2107_v38, 0.0  ;;  %vm1841_vm9 = vweird.f32 %v1658_v4  ;;  %v3028_v38 = vld [vmem:[%s4238_s11 + $0x10] sm:$0xff] }
 0x3c5   : > { %v1824_v11 = vsel %vm1823_vm4, %v3126_v60, %v1820_v12  ;;  %v1827_v24 = vmul.f32 %v3128_v18, %v1826_v54  ;;  %v1533_v14 = vpop.f32.mrf.mxu3 }
 0x3c6   : > { %v2036_v10 = vmul.f32 %v1824_v11, %v3838_v2  ;;  %v4009_v27 = vsub.f32 %v3747_v55, %v1533_v14  ;;  %v3029_v14 = vld [vmem:[%s4238_s11 + $0x18] sm:$0xff] }
 0x3c7   : > { %v1828_v9 = vmul.f32 0.5, %v1827_v24  ;;  %2454 = vmatpush.bf16.msrb.mxu2 %v3029_v14 }
 0x3c8   : > { %v1599_v34 = vmul.f32 %v4009_v27, %v4009_v27  ;;  %v2072_v30 = vmul.f32 %v3907_v41, %v2036_v10 }
 0x3c9   : > { %v1829_v61 = vsub.f32 1.5, %v1828_v9  ;;  %v1660_v42 = vpop.f32.mrf.mxu0 }
 0x3ca   : > { %v3130_v19 = vpop.eup %3129  ;;  %v1661_v47 = vadd.f32 1e-05, %v1660_v42  ;;  %v1615_v2 = vpack.c.bf16 %v1599_v34, %v1598_v46  ;;  %v2108_v55 = vadd.f32 %v3916_v23, %v2072_v30 }
 0x3cb   : > { %v1830_v52 = vmul.f32 %v3128_v18, %v1829_v61  ;;  %v1836_v33 = vmul.f32 %v3130_v19, %v1658_v4  ;;  %vm1842_vm8 = vweird.f32 %v3130_v19  ;;  %2455 = vmatpush.bf16.msrb.mxu2 %v3028_v38 }
 0x3cc   : > { %3131 = vrsqrt.f32 %v1661_v47  ;;  %1699 = vmatmul.bf16.gmra.mxu0 %v1615_v2  ;;  %v2140_v3 = vmax.f32 %v2108_v55, 0.0  ;;  %vm1843_vm10 = vmor %vm1841_vm9, %vm1842_vm8  ;;  %vm1851_vm12 = vweird.f32 %v1661_v47 }
 0x3cd   : > { %v1834_v51 = vsel %vm1833_vm7, %v3128_v18, %v1830_v52  ;;  %v1837_v48 = vmul.f32 %v3130_v19, %v1836_v33  ;;  %v3027_v33 = vld [vmem:[%s4238_s11 + $0x8] sm:$0xff] }
 0x3ce   : > { %v2183_v60 = vpack.c.bf16 %v2140_v3, %v2139_v1  ;;  %v2037_v35 = vmul.f32 %v1834_v51, %v3850_v56 }
 0x3cf   : > { %v1838_v43 = vmul.f32 0.5, %v1837_v48  ;;  %2456 = vmatpush.bf16.msrb.mxu2 %v3027_v33 }
 0x3d0   : > { %2278 = vmatmul.bf16.gmra.mxu1 %v2183_v60  ;;  %v2073_v58 = vmul.f32 %v3907_v41, %v2037_v35  ;;  %v3026_v60 = vld [vmem:[%s4238_s11] sm:$0xff] }
 0x3d1   : > { %v1839_v25 = vsub.f32 1.5, %v1838_v43  ;;  %v1662_v59 = vpop.f32.mrf.mxu0 }
 0x3d2   : > { %v3132_v32 = vpop.eup %3131  ;;  %v1663_v13 = vadd.f32 1e-05, %v1662_v59  ;;  %v2109_v17 = vadd.f32 %v3916_v23, %v2073_v58 }
 0x3d3   : > { %v1840_v45 = vmul.f32 %v3130_v19, %v1839_v25  ;;  %v1846_v29 = vmul.f32 %v3132_v32, %v1661_v47  ;;  %vm1852_vm11 = vweird.f32 %v3132_v32  ;;  %2457 = vmatpush.bf16.msrb.mxu2 %v3026_v60 }
 0x3d4   : > { %3133 = vrsqrt.f32 %v1663_v13  ;;  %vm1853_vm13 = vmor %vm1851_vm12, %vm1852_vm11  ;;  %vm1861_vm15 = vweird.f32 %v1663_v13 }
 0x3d5   : > { %v1844_v21 = vsel %vm1843_vm10, %v3130_v19, %v1840_v45  ;;  %v1847_v20 = vmul.f32 %v3132_v32, %v1846_v29 }
 0x3d6   : > { %v2038_v16 = vmul.f32 %v1844_v21, %v3853_v7  ;;  %v2141_v7 = vmax.f32 %v2109_v17, 0.0 }
 0x3d7   : > { %v1848_v63 = vmul.f32 0.5, %v1847_v20 }
 0x3d8   : > { %v2074_v56 = vmul.f32 %v3907_v41, %v2038_v16 }
 0x3d9   : > { %v1849_v18 = vsub.f32 1.5, %v1848_v63  ;;  %v1665_v12 = vpop.f32.mrf.mxu0 }
 0x3da   : > { %v3134_v54 = vpop.eup %3133  ;;  %v1666_v22 = vadd.f32 1e-05, %v1665_v12  ;;  %v2110_v4 = vadd.f32 %v3916_v23, %v2074_v56 }
 0x3db   : > { %v1850_v11 = vmul.f32 %v3132_v32, %v1849_v18  ;;  %v1856_v24 = vmul.f32 %v3134_v54, %v1663_v13  ;;  %vm1862_vm14 = vweird.f32 %v3134_v54 }
 0x3dc   : > { %3135 = vrsqrt.f32 %v1666_v22  ;;  %v2142_v10 = vmax.f32 %v2110_v4, 0.0  ;;  %vm1863_vm0 = vmor %vm1861_vm15, %vm1862_vm14  ;;  %vm1871_vm2 = vweird.f32 %v1666_v22 }
 0x3dd   : > { %v1854_v9 = vsel %vm1853_vm13, %v3132_v32, %v1850_v11  ;;  %v1857_v46 = vmul.f32 %v3134_v54, %v1856_v24 }
 0x3de   : > { %v2184_v34 = vpack.c.bf16 %v2142_v10, %v2141_v7  ;;  %v2039_v61 = vmul.f32 %v1854_v9, %v3862_v37 }
 0x3df   : > { %v1858_v30 = vmul.f32 0.5, %v1857_v46 }
 0x3e0   : > { %2283 = vmatmul.bf16.gmra.mxu1 %v2184_v34  ;;  %v2075_v1 = vmul.f32 %v3907_v41, %v2039_v61 }
 0x3e1   : > { %v1859_v42 = vsub.f32 1.5, %v1858_v30  ;;  %v1667_v19 = vpop.f32.mrf.mxu0 }
 0x3e2   : > { %v3136_v47 = vpop.eup %3135  ;;  %v1668_v2 = vadd.f32 1e-05, %v1667_v19  ;;  %v2111_v43 = vadd.f32 %v3916_v23, %v2075_v1 }
 0x3e3   : > { %v1860_v55 = vmul.f32 %v3134_v54, %v1859_v42  ;;  %v1866_v52 = vmul.f32 %v3136_v47, %v1666_v22  ;;  %vm1872_vm1 = vweird.f32 %v3136_v47 }
 0x3e4   : > { %3137 = vrsqrt.f32 %v1668_v2  ;;  %vm1873_vm3 = vmor %vm1871_vm2, %vm1872_vm1  ;;  %v2143_v29 = vmax.f32 %v2111_v43, 0.0  ;;  %vm1881_vm5 = vweird.f32 %v1668_v2 }
 0x3e5   : > { %v1864_v3 = vsel %vm1863_vm0, %v3134_v54, %v1860_v55  ;;  %v1867_v37 = vmul.f32 %v3136_v47, %v1866_v52 }
 0x3e6   : > { %v2040_v51 = vmul.f32 %v1864_v3, %v3865_v40 }
 0x3e7   : > { %v1868_v48 = vmul.f32 0.5, %v1867_v37  ;;  %v4055_v37 = vld [vmem:[%s4237_s10] ss:$0 sm:$0xff] }
 0x3e8   : > { %v2076_v57 = vmul.f32 %v3907_v41, %v2040_v51 }
 0x3e9   : > { %v1869_v35 = vsub.f32 1.5, %v1868_v48  ;;  %v1670_v25 = vpop.f32.mrf.mxu0 }
 0x3ea   : > { %v3138_v59 = vpop.eup %3137  ;;  %v1671_v32 = vadd.f32 1e-05, %v1670_v25  ;;  %v2112_v13 = vadd.f32 %v3916_v23, %v2076_v57 }
 0x3eb   : > { %v1870_v45 = vmul.f32 %v3136_v47, %v1869_v35  ;;  %v1876_v40 = vmul.f32 %v3138_v59, %v1668_v2  ;;  %vm1882_vm4 = vweird.f32 %v3138_v59 }
 0x3ec   : > { %3139 = vrsqrt.f32 %v1671_v32  ;;  %v2144_v58 = vmax.f32 %v2112_v13, 0.0  ;;  %vm1883_vm6 = vmor %vm1881_vm5, %vm1882_vm4  ;;  %vm1891_vm8 = vweird.f32 %v1671_v32 }
 0x3ed   : > { %v1874_v21 = vsel %vm1873_vm3, %v3136_v47, %v1870_v45  ;;  %v1877_v20 = vmul.f32 %v3138_v59, %v1876_v40 }
 0x3ee   : > { %v2185_v16 = vpack.c.bf16 %v2144_v58, %v2143_v29  ;;  %v2041_v56 = vmul.f32 %v1874_v21, %v3878_v44 }
 0x3ef   : > { %v1878_v63 = vmul.f32 0.5, %v1877_v20 }
 0x3f0   : > { %2288 = vmatmul.bf16.gmra.mxu1 %v2185_v16  ;;  %v2077_v11 = vmul.f32 %v3907_v41, %v2041_v56 }
 0x3f1   : > { %v1879_v17 = vsub.f32 1.5, %v1878_v63  ;;  %v1672_v18 = vpop.f32.mrf.mxu0 }
 0x3f2   : > { %v3140_v12 = vpop.eup %3139  ;;  %v1673_v54 = vadd.f32 1e-05, %v1672_v18  ;;  %v2113_v9 = vadd.f32 %v3916_v23, %v2077_v11 }
 0x3f3   : > { %v1880_v4 = vmul.f32 %v3138_v59, %v1879_v17  ;;  %v1886_v22 = vmul.f32 %v3140_v12, %v1671_v32  ;;  %vm1892_vm7 = vweird.f32 %v3140_v12 }
 0x3f4   : > { %3141 = vrsqrt.f32 %v1673_v54  ;;  %vm1893_vm9 = vmor %vm1891_vm8, %vm1892_vm7  ;;  %v2145_v47 = vmax.f32 %v2113_v9, 0.0  ;;  %vm1901_vm11 = vweird.f32 %v1673_v54 }
 0x3f5   : > { %v1884_v24 = vsel %vm1883_vm6, %v3138_v59, %v1880_v4  ;;  %v1887_v14 = vmul.f32 %v3140_v12, %v1886_v22 }
 0x3f6   : > { %v2042_v7 = vmul.f32 %v1884_v24, %v3881_v36 }
 0x3f7   : > { %v1888_v10 = vmul.f32 0.5, %v1887_v14 }
 0x3f8   : > { %v2078_v44 = vmul.f32 %v3907_v41, %v2042_v7 }
 0x3f9   : > { %v1889_v46 = vsub.f32 1.5, %v1888_v10  ;;  %v1675_v34 = vpop.f32.mrf.mxu0 }
 0x3fa   : > { %v3142_v30 = vpop.eup %3141  ;;  %v1676_v38 = vadd.f32 1e-05, %v1675_v34  ;;  %v2114_v61 = vadd.f32 %v3916_v23, %v2078_v44 }
 0x3fb   : > { %v1890_v42 = vmul.f32 %v3140_v12, %v1889_v46  ;;  %v1896_v19 = vmul.f32 %v3142_v30, %v1673_v54  ;;  %vm1902_vm10 = vweird.f32 %v3142_v30 }
 0x3fc   : > { %3143 = vrsqrt.f32 %v1676_v38  ;;  %v2146_v2 = vmax.f32 %v2114_v61, 0.0  ;;  %vm1903_vm12 = vmor %vm1901_vm11, %vm1902_vm10  ;;  %vm1911_vm14 = vweird.f32 %v1676_v38 }
 0x3fd   : > { %v1894_v36 = vsel %vm1893_vm9, %v3140_v12, %v1890_v42  ;;  %v1897_v55 = vmul.f32 %v3142_v30, %v1896_v19  ;;  %v2254_v52 = vpop.f32.mrf.mxu1 }
 0x3fe   : > { %v2186_v33 = vpack.c.bf16 %v2146_v2, %v2145_v47  ;;  %v2043_v3 = vmul.f32 %v1894_v36, %v3894_v8  ;;  %v2255_v25 = vadd.f32 %v4055_v37, %v2254_v52 }
 0x3ff   : > { %v1898_v1 = vmul.f32 0.5, %v1897_v55 }
 0x400   : > { %2293 = vmatmul.bf16.gmra.mxu1 %v2186_v33  ;;  %v2079_v8 = vmul.f32 %v3907_v41, %v2043_v3  ;;  %v2334_v58 = vmax.f32 %v2255_v25, 0.0 }
 0x401   : > { %v1899_v51 = vsub.f32 1.5, %v1898_v1  ;;  %v1677_v48 = vpop.f32.mrf.mxu0 }
 0x402   : > { %v3144_v60 = vpop.eup %3143  ;;  %v1678_v57 = vadd.f32 1e-05, %v1677_v48  ;;  %v2115_v16 = vadd.f32 %v3916_v23, %v2079_v8 }
 0x403   : > { %v1900_v43 = vmul.f32 %v3142_v30, %v1899_v51  ;;  %v1906_v35 = vmul.f32 %v3144_v60, %v1676_v38  ;;  %vm1912_vm13 = vweird.f32 %v3144_v60 }
 0x404   : > { %3145 = vrsqrt.f32 %v1678_v57  ;;  %vm1913_vm15 = vmor %vm1911_vm14, %vm1912_vm13  ;;  %v2147_v22 = vmax.f32 %v2115_v16, 0.0  ;;  %vm1921_vm1 = vweird.f32 %v1678_v57 }
 0x405   : > { %v1904_v59 = vsel %vm1903_vm12, %v3142_v30, %v1900_v43  ;;  %v1907_v32 = vmul.f32 %v3144_v60, %v1906_v35  ;;  %v2256_v13 = vpop.f32.mrf.mxu1 }
 0x406   : > { %v2044_v45 = vmul.f32 %v1904_v59, %v3897_v49  ;;  %v2257_v40 = vadd.f32 %v4055_v37, %v2256_v13 }
 0x407   : > { %v1908_v29 = vmul.f32 0.5, %v1907_v32 }
 0x408   : > { %v2335_v21 = vmax.f32 %v2257_v40, 0.0  ;;  %v2080_v20 = vmul.f32 %v3907_v41, %v2044_v45 }
 0x409   : > { %v1909_v63 = vsub.f32 1.5, %v1908_v29  ;;  %v1680_v56 = vpop.f32.mrf.mxu0 }
 0x40a   : > { %v3146_v17 = vpop.eup %3145  ;;  %v2383_v18 = vpack.c.bf16 %v2335_v21, %v2334_v58  ;;  %v1681_v12 = vadd.f32 1e-05, %v1680_v56  ;;  %v2116_v54 = vadd.f32 %v3916_v23, %v2080_v20 }
 0x40b   : > { %v1910_v4 = vmul.f32 %v3144_v60, %v1909_v63  ;;  %v1916_v49 = vmul.f32 %v3146_v17, %v1678_v57  ;;  %vm1922_vm0 = vweird.f32 %v3146_v17 }
 0x40c   : > { %3147 = vrsqrt.f32 %v1681_v12  ;;  %2458 = vmatmul.bf16.vlgmr.msrb.gmra.mxu2 %v2383_v18  ;;  %v2148_v11 = vmax.f32 %v2116_v54, 0.0  ;;  %vm1923_vm2 = vmor %vm1921_vm1, %vm1922_vm0  ;;  %vm1931_vm4 = vweird.f32 %v1681_v12 }
 0x40d   : > { %v1914_v24 = vsel %vm1913_vm15, %v3144_v60, %v1910_v4  ;;  %v1917_v14 = vmul.f32 %v3146_v17, %v1916_v49  ;;  %v2259_v7 = vpop.f32.mrf.mxu1 }
 0x40e   : > { %v2187_v10 = vpack.c.bf16 %v2148_v11, %v2147_v22  ;;  %v2045_v9 = vmul.f32 %v1914_v24, %v3911_v50  ;;  %v2260_v19 = vadd.f32 %v4055_v37, %v2259_v7 }
 0x40f   : > { %v1918_v44 = vmul.f32 0.5, %v1917_v14 }
 0x410   : > { %2298 = vmatmul.bf16.gmra.mxu1 %v2187_v10  ;;  %v2081_v47 = vmul.f32 %v3907_v41, %v2045_v9  ;;  %v2336_v1 = vmax.f32 %v2260_v19, 0.0 }
 0x411   : > { %v1919_v46 = vsub.f32 1.5, %v1918_v44  ;;  %v1682_v34 = vpop.f32.mrf.mxu0 }
 0x412   : > { %v3148_v30 = vpop.eup %3147  ;;  %v1683_v61 = vadd.f32 1e-05, %v1682_v34  ;;  %v2117_v48 = vadd.f32 %v3916_v23, %v2081_v47 }
 0x413   : > { %v1920_v38 = vmul.f32 %v3146_v17, %v1919_v46  ;;  %v1926_v42 = vmul.f32 %v3148_v30, %v1681_v12  ;;  %vm1932_vm3 = vweird.f32 %v3148_v30 }
 0x414   : > { %3149 = vrsqrt.f32 %v1683_v61  ;;  %vm1933_vm5 = vmor %vm1931_vm4, %vm1932_vm3  ;;  %v2149_v32 = vmax.f32 %v2117_v48, 0.0  ;;  %vm1941_vm7 = vweird.f32 %v1683_v61 }
 0x415   : > { %v1924_v2 = vsel %vm1923_vm2, %v3146_v17, %v1920_v38  ;;  %v1927_v36 = vmul.f32 %v3148_v30, %v1926_v42  ;;  %v2261_v55 = vpop.f32.mrf.mxu1 }
 0x416   : > { %v2046_v50 = vmul.f32 %v1924_v2, %v3920_v0  ;;  %v2262_v52 = vadd.f32 %v4055_v37, %v2261_v55 }
 0x417   : > { %v1928_v33 = vmul.f32 0.5, %v1927_v36 }
 0x418   : > { %v2337_v3 = vmax.f32 %v2262_v52, 0.0  ;;  %v2082_v51 = vmul.f32 %v3907_v41, %v2046_v50 }
 0x419   : > { %v1929_v60 = vsub.f32 1.5, %v1928_v33  ;;  %v1685_v57 = vpop.f32.mrf.mxu0 }
 0x41a   : > { %v3150_v43 = vpop.eup %3149  ;;  %v1686_v35 = vadd.f32 1e-05, %v1685_v57  ;;  %v2384_v25 = vpack.c.bf16 %v2337_v3, %v2336_v1  ;;  %v2118_v8 = vadd.f32 %v3916_v23, %v2082_v51 }
 0x41b   : > { %v1930_v59 = vmul.f32 %v3148_v30, %v1929_v60  ;;  %v1936_v0 = vmul.f32 %v3150_v43, %v1683_v61  ;;  %vm1942_vm6 = vweird.f32 %v3150_v43 }
 0x41c   : > { %3151 = vrsqrt.f32 %v1686_v35  ;;  %2463 = vmatmul.bf16.gmra.mxu2 %v2384_v25  ;;  %v2150_v13 = vmax.f32 %v2118_v8, 0.0  ;;  %vm1943_vm8 = vmor %vm1941_vm7, %vm1942_vm6  ;;  %vm1951_vm10 = vweird.f32 %v1686_v35 }
 0x41d   : > { %v1934_v45 = vsel %vm1933_vm5, %v3148_v30, %v1930_v59  ;;  %v1937_v40 = vmul.f32 %v3150_v43, %v1936_v0  ;;  %v2264_v29 = vpop.f32.mrf.mxu1 }
 0x41e   : > { %v2188_v58 = vpack.c.bf16 %v2150_v13, %v2149_v32  ;;  %v2047_v20 = vmul.f32 %v1934_v45, %v3934_v53  ;;  %v2265_v54 = vadd.f32 %v4055_v37, %v2264_v29  ;;  %v4094_v29 = vld [vmem:[%s4235_s8] ss:$0 sm:$0xff] }
 0x41f   : > { %v1938_v21 = vmul.f32 0.5, %v1937_v40 }
 0x420   : > { %2303 = vmatmul.bf16.gmra.mxu1 %v2188_v58  ;;  %v2083_v4 = vmul.f32 %v3907_v41, %v2047_v20  ;;  %v2338_v7 = vmax.f32 %v2265_v54, 0.0 }
 0x421   : > { %v1939_v16 = vsub.f32 1.5, %v1938_v21  ;;  %v1687_v63 = vpop.f32.mrf.mxu0 }
 0x422   : > { %v3152_v56 = vpop.eup %3151  ;;  %v1688_v17 = vadd.f32 1e-05, %v1687_v63  ;;  %v2119_v9 = vadd.f32 %v3916_v23, %v2083_v4 }
 0x423   : > { %v1940_v18 = vmul.f32 %v3150_v43, %v1939_v16  ;;  %v1946_v12 = vmul.f32 %v3152_v56, %v1686_v35  ;;  %vm1952_vm9 = vweird.f32 %v3152_v56 }
 0x424   : > { %3153 = vrsqrt.f32 %v1688_v17  ;;  %vm1953_vm11 = vmor %vm1951_vm10, %vm1952_vm9  ;;  %v2151_v47 = vmax.f32 %v2119_v9, 0.0  ;;  %vm1961_vm13 = vweird.f32 %v1688_v17 }
 0x425   : > { %v1944_v49 = vsel %vm1943_vm8, %v3150_v43, %v1940_v18  ;;  %v1947_v22 = vmul.f32 %v3152_v56, %v1946_v12  ;;  %v2266_v11 = vpop.f32.mrf.mxu1  ;;  %v4085_v43 = vld [vmem:[%s4234_s7] ss:$0 sm:$0xff] }
 0x426   : > { %v2048_v53 = vmul.f32 %v1944_v49, %v3938_v26  ;;  %v2267_v24 = vadd.f32 %v4055_v37, %v2266_v11 }
 0x427   : > { %v1948_v14 = vmul.f32 0.5, %v1947_v22 }
 0x428   : > { %v2339_v10 = vmax.f32 %v2267_v24, 0.0  ;;  %v2084_v44 = vmul.f32 %v3907_v41, %v2048_v53 }
 0x429   : > { %v1949_v46 = vsub.f32 1.5, %v1948_v14  ;;  %v1690_v34 = vpop.f32.mrf.mxu0 }
 0x42a   : > { %v3154_v30 = vpop.eup %3153  ;;  %v1691_v61 = vadd.f32 1e-05, %v1690_v34  ;;  %v2385_v38 = vpack.c.bf16 %v2339_v10, %v2338_v7  ;;  %v2120_v42 = vadd.f32 %v3916_v23, %v2084_v44 }
 0x42b   : > { %v1950_v19 = vmul.f32 %v3152_v56, %v1949_v46  ;;  %v1956_v26 = vmul.f32 %v3154_v30, %v1688_v17  ;;  %vm1962_vm12 = vweird.f32 %v3154_v30 }
 0x42c   : > { %3155 = vrsqrt.f32 %v1691_v61  ;;  %2468 = vmatmul.bf16.gmra.mxu2 %v2385_v38  ;;  %v2152_v2 = vmax.f32 %v2120_v42, 0.0  ;;  %vm1963_vm14 = vmor %vm1961_vm13, %vm1962_vm12  ;;  %vm1971_vm0 = vweird.f32 %v1691_v61 }
 0x42d   : > { %v1954_v36 = vsel %vm1953_vm11, %v3152_v56, %v1950_v19  ;;  %v1957_v41 = vmul.f32 %v3154_v30, %v1956_v26  ;;  %v2269_v55 = vpop.f32.mrf.mxu1 }
 0x42e   : > { %v2189_v50 = vpack.c.bf16 %v2152_v2, %v2151_v47  ;;  %v2049_v33 = vmul.f32 %v1954_v36, %v3950_v62  ;;  %v2270_v57 = vadd.f32 %v4055_v37, %v2269_v55 }
 0x42f   : > { %v1958_v52 = vmul.f32 0.5, %v1957_v41 }
 0x430   : > { %2308 = vmatmul.bf16.gmra.mxu1 %v2189_v50  ;;  %v2085_v62 = vmul.f32 %v4085_v43, %v2049_v33  ;;  %v2340_v13 = vmax.f32 %v2270_v57, 0.0 }
 0x431   : > { %v1959_v1 = vsub.f32 1.5, %v1958_v52  ;;  %v1692_v3 = vpop.f32.mrf.mxu0 }
 0x432   : > { %v3156_v23 = vpop.eup %3155  ;;  %v1693_v51 = vadd.f32 1e-05, %v1692_v3  ;;  %v2121_v58 = vadd.f32 %v4094_v29, %v2085_v62 }
 0x433   : > { %v1960_v48 = vmul.f32 %v3154_v30, %v1959_v1  ;;  %v1966_v60 = vmul.f32 %v3156_v23, %v1691_v61  ;;  %vm1972_vm15 = vweird.f32 %v3156_v23 }
 0x434   : > { %3157 = vrsqrt.f32 %v1693_v51  ;;  %vm1973_vm1 = vmor %vm1971_vm0, %vm1972_vm15  ;;  %v2153_v12 = vmax.f32 %v2121_v58, 0.0  ;;  %vm1981_vm3 = vweird.f32 %v1693_v51 }
 0x435   : > { %v1964_v35 = vsel %vm1963_vm14, %v3154_v30, %v1960_v48  ;;  %v1967_v25 = vmul.f32 %v3156_v23, %v1966_v60  ;;  %v2271_v8 = vpop.f32.mrf.mxu1 }
 0x436   : > { %v2050_v59 = vmul.f32 %v1964_v35, %v3954_v15  ;;  %v2272_v0 = vadd.f32 %v4055_v37, %v2271_v8 }
 0x437   : > { %v1968_v32 = vmul.f32 0.5, %v1967_v25 }
 0x438   : > { %v2341_v45 = vmax.f32 %v2272_v0, 0.0  ;;  %v2086_v40 = vmul.f32 %v4085_v43, %v2050_v59 }
 0x439   : > { %v1969_v21 = vsub.f32 1.5, %v1968_v32  ;;  %v1695_v20 = vpop.f32.mrf.mxu0 }
 0x43a   : > { %v3158_v16 = vpop.eup %3157  ;;  %v1696_v63 = vadd.f32 1e-05, %v1695_v20  ;;  %v2386_v15 = vpack.c.bf16 %v2341_v45, %v2340_v13  ;;  %v2122_v56 = vadd.f32 %v4094_v29, %v2086_v40 }
 0x43b   : > { %v1970_v17 = vmul.f32 %v3156_v23, %v1969_v21  ;;  %v1976_v18 = vmul.f32 %v3158_v16, %v1693_v51  ;;  %vm1982_vm2 = vweird.f32 %v3158_v16 }
 0x43c   : > { %3159 = vrsqrt.f32 %v1696_v63  ;;  %2473 = vmatmul.bf16.gmra.mxu2 %v2386_v15  ;;  %v2154_v54 = vmax.f32 %v2122_v56, 0.0  ;;  %vm1983_vm4 = vmor %vm1981_vm3, %vm1982_vm2  ;;  %vm1991_vm6 = vweird.f32 %v1696_v63 }
 0x43d   : > { %v1974_v4 = vsel %vm1973_vm1, %v3156_v23, %v1970_v17  ;;  %v1977_v49 = vmul.f32 %v3158_v16, %v1976_v18  ;;  %v2274_v22 = vpop.f32.mrf.mxu1  ;;  %vm2624_vm1 = vcmask 1040384  }
 0x43e   : > { %v2190_v11 = vpack.c.bf16 %v2154_v54, %v2153_v12  ;;  %v2051_v24 = vmul.f32 %v1974_v4, %v3969_v39  ;;  %v2275_v34 = vadd.f32 %v4055_v37, %v2274_v22 }
 0x43f   : > { %v1978_v53 = vmul.f32 0.5, %v1977_v49 }
 0x440   : > { %2313 = vmatmul.bf16.gmra.mxu1 %v2190_v11  ;;  %v2087_v30 = vmul.f32 %v4085_v43, %v2051_v24  ;;  %v2342_v47 = vmax.f32 %v2275_v34, 0.0 }
 0x441   : > { %v1979_v14 = vsub.f32 1.5, %v1978_v53  ;;  %v1697_v7 = vpop.f32.mrf.mxu0 }
 0x442   : > { %v3160_v10 = vpop.eup %3159  ;;  %v1698_v44 = vadd.f32 1e-05, %v1697_v7  ;;  %v2123_v41 = vadd.f32 %v4094_v29, %v2087_v30 }
 0x443   : > { %v1980_v9 = vmul.f32 %v3158_v16, %v1979_v14  ;;  %v1986_v46 = vmul.f32 %v3160_v10, %v1696_v63  ;;  %vm1992_vm5 = vweird.f32 %v3160_v10 }
 0x444   : > { %3161 = vrsqrt.f32 %v1698_v44  ;;  %vm1993_vm7 = vmor %vm1991_vm6, %vm1992_vm5  ;;  %v2155_v51 = vmax.f32 %v2123_v41, 0.0  ;;  %vm2001_vm9 = vweird.f32 %v1698_v44 }
 0x445   : > { %v1984_v61 = vsel %vm1983_vm4, %v3158_v16, %v1980_v9  ;;  %v1987_v38 = vmul.f32 %v3160_v10, %v1986_v46  ;;  %v2276_v42 = vpop.f32.mrf.mxu1 }
 0x446   : > { %v2052_v39 = vmul.f32 %v1984_v61, %v3973_v28  ;;  %v2277_v19 = vadd.f32 %v4055_v37, %v2276_v42 }
 0x447   : > { %v1988_v26 = vmul.f32 0.5, %v1987_v38 }
 0x448   : > { %v2343_v2 = vmax.f32 %v2277_v19, 0.0  ;;  %v2088_v36 = vmul.f32 %v4085_v43, %v2052_v39 }
 0x449   : > { %v1989_v55 = vsub.f32 1.5, %v1988_v26  ;;  %v1700_v50 = vpop.f32.mrf.mxu0 }
 0x44a   : > { %v3162_v52 = vpop.eup %3161  ;;  %v2387_v33 = vpack.c.bf16 %v2343_v2, %v2342_v47  ;;  %v1701_v1 = vadd.f32 1e-05, %v1700_v50  ;;  %v2124_v3 = vadd.f32 %v4094_v29, %v2088_v36 }
 0x44b   : > { %v1990_v23 = vmul.f32 %v3160_v10, %v1989_v55  ;;  %v1996_v28 = vmul.f32 %v3162_v52, %v1698_v44  ;;  %vm2002_vm8 = vweird.f32 %v3162_v52 }
 0x44c   : > { %3163 = vrsqrt.f32 %v1701_v1  ;;  %2478 = vmatmul.bf16.gmra.mxu2 %v2387_v33  ;;  %v2156_v48 = vmax.f32 %v2124_v3, 0.0  ;;  %vm2003_vm10 = vmor %vm2001_vm9, %vm2002_vm8  ;;  %vm2011_vm12 = vweird.f32 %v1701_v1 }
 0x44d   : > { %v1994_v60 = vsel %vm1993_vm7, %v3160_v10, %v1990_v23  ;;  %v1997_v57 = vmul.f32 %v3162_v52, %v1996_v28  ;;  %v2279_v62 = vpop.f32.mrf.mxu1 }
 0x44e   : > { %v2191_v35 = vpack.c.bf16 %v2156_v48, %v2155_v51  ;;  %v2053_v8 = vmul.f32 %v1994_v60, %v3985_v31  ;;  %v2280_v58 = vadd.f32 %v4055_v37, %v2279_v62 }
 0x44f   : > { %v1998_v25 = vmul.f32 0.5, %v1997_v57 }
 0x450   : > { %2318 = vmatmul.bf16.gmra.mxu1 %v2191_v35  ;;  %v2089_v21 = vmul.f32 %v4085_v43, %v2053_v8  ;;  %v2344_v17 = vmax.f32 %v2280_v58, 0.0 }
 0x451   : > { %v1999_v59 = vsub.f32 1.5, %v1998_v25  ;;  %v1702_v0 = vpop.f32.mrf.mxu0 }
 0x452   : > { %v3164_v32 = vpop.eup %3163  ;;  %v1703_v13 = vadd.f32 1e-05, %v1702_v0  ;;  %v2125_v54 = vadd.f32 %v4094_v29, %v2089_v21 }
 0x453   : > { %v2000_v45 = vmul.f32 %v3162_v52, %v1999_v59  ;;  %v2006_v40 = vmul.f32 %v3164_v32, %v1701_v1  ;;  %vm2012_vm11 = vweird.f32 %v3164_v32 }
 0x454   : > { %3165 = vrsqrt.f32 %v1703_v13  ;;  %vm2013_vm13 = vmor %vm2011_vm12, %vm2012_vm11  ;;  %vm2021_vm15 = vweird.f32 %v1703_v13 }
 0x455   : > { %v2004_v20 = vsel %vm2003_vm10, %v3162_v52, %v2000_v45  ;;  %v2007_v16 = vmul.f32 %v3164_v32, %v2006_v40  ;;  %v2281_v63 = vpop.f32.mrf.mxu1 }
 0x456   : > { %v2054_v31 = vmul.f32 %v2004_v20, %v3990_v6  ;;  %v2282_v15 = vadd.f32 %v4055_v37, %v2281_v63  ;;  %v2157_v6 = vmax.f32 %v2125_v54, 0.0 }
 0x457   : > { %v2008_v56 = vmul.f32 0.5, %v2007_v16 }
 0x458   : > { %v2345_v18 = vmax.f32 %v2282_v15, 0.0  ;;  %v2090_v12 = vmul.f32 %v4085_v43, %v2054_v31 }
 0x459   : > { %v2009_v4 = vsub.f32 1.5, %v2008_v56 }
 0x45a   : > { %v3166_v49 = vpop.eup %3165  ;;  %v2388_v22 = vpack.c.bf16 %v2345_v18, %v2344_v17  ;;  %v2126_v11 = vadd.f32 %v4094_v29, %v2090_v12 }
 0x45b   : > { %v2010_v53 = vmul.f32 %v3164_v32, %v2009_v4  ;;  %v2016_v24 = vmul.f32 %v3166_v49, %v1703_v13  ;;  %vm2022_vm14 = vweird.f32 %v3166_v49 }
 0x45c   : > { %2483 = vmatmul.bf16.gmra.mxu2 %v2388_v22  ;;  %v2158_v14 = vmax.f32 %v2126_v11, 0.0  ;;  %vm2023_vm0 = vmor %vm2021_vm15, %vm2022_vm14 }
 0x45d   : > { %v2014_v7 = vsel %vm2013_vm13, %v3164_v32, %v2010_v53  ;;  %v2017_v10 = vmul.f32 %v3166_v49, %v2016_v24  ;;  %v2284_v44 = vpop.f32.mrf.mxu1  ;;  %v4129_v32 = vld [vmem:[%s4239_s12] ss:$0 sm:$0xff] }
 0x45e   : > { %v2192_v9 = vpack.c.bf16 %v2158_v14, %v2157_v6  ;;  %v2055_v34 = vmul.f32 %v2014_v7, %v4004_v5  ;;  %v2285_v38 = vadd.f32 %v4055_v37, %v2284_v44 }
 0x45f   : > { %v2018_v46 = vmul.f32 0.5, %v2017_v10 }
 0x460   : > { %2323 = vmatmul.bf16.gmra.mxu1 %v2192_v9  ;;  %v2091_v42 = vmul.f32 %v4085_v43, %v2055_v34  ;;  %v2346_v2 = vmax.f32 %v2285_v38, 0.0 }
 0x461   : > { %v2019_v30 = vsub.f32 1.5, %v2018_v46 }
 0x462   : > { %v2127_v41 = vadd.f32 %v4094_v29, %v2091_v42 }
 0x463   : > { %v2020_v61 = vmul.f32 %v3166_v49, %v2019_v30 }
 0x464   : > { %v2159_v52 = vmax.f32 %v2127_v41, 0.0 }
 0x465   : > { %v2024_v39 = vsel %vm2023_vm0, %v3166_v49, %v2020_v61  ;;  %v2286_v19 = vpop.f32.mrf.mxu1 }
 0x466   : > { %v2056_v26 = vmul.f32 %v2024_v39, %v4009_v27  ;;  %v2287_v47 = vadd.f32 %v4055_v37, %v2286_v19 }
 0x468   : > { %v2347_v36 = vmax.f32 %v2287_v47, 0.0  ;;  %v2092_v5 = vmul.f32 %v4085_v43, %v2056_v26 }
 0x46a   : > { %v2389_v55 = vpack.c.bf16 %v2347_v36, %v2346_v2  ;;  %v2128_v50 = vadd.f32 %v4094_v29, %v2092_v5 }
 0x46c   : > { %2488 = vmatmul.bf16.gmra.mxu2 %v2389_v55  ;;  %v2160_v33 = vmax.f32 %v2128_v50, 0.0 }
 0x46d   : > { %v2289_v1 = vpop.f32.mrf.mxu1 }
 0x46e   : > { %v2193_v3 = vpack.c.bf16 %v2160_v33, %v2159_v52  ;;  %v2290_v23 = vadd.f32 %v4055_v37, %v2289_v1 }
 0x470   : > { %2328 = vmatmul.bf16.gmra.mxu1 %v2193_v3  ;;  %v2348_v51 = vmax.f32 %v2290_v23, 0.0 }
 0x475   : > { %v2291_v27 = vpop.f32.mrf.mxu1 }
 0x476   : > { %v2292_v28 = vadd.f32 %v4055_v37, %v2291_v27 }
 0x478   : > { %v2349_v48 = vmax.f32 %v2292_v28, 0.0 }
 0x47a   : > { %v2390_v60 = vpack.c.bf16 %v2349_v48, %v2348_v51 }
 0x47c   : > { %2493 = vmatmul.bf16.gmra.mxu2 %v2390_v60 }
 0x47d   : > { %v2294_v43 = vpop.f32.mrf.mxu1 }
 0x47e   : > { %v2295_v57 = vadd.f32 %v4055_v37, %v2294_v43 }
 0x480   : > { %v2350_v35 = vmax.f32 %v2295_v57, 0.0 }
 0x485   : > { %v2296_v62 = vpop.f32.mrf.mxu1 }
 0x486   : > { %v2297_v29 = vadd.f32 %v4055_v37, %v2296_v62 }
 0x488   : > { %v2351_v25 = vmax.f32 %v2297_v29, 0.0 }
 0x48a   : > { %v2391_v8 = vpack.c.bf16 %v2351_v25, %v2350_v35 }
 0x48c   : > { %2498 = vmatmul.bf16.gmra.mxu2 %v2391_v8 }
 0x48d   : > { %v2299_v59 = vpop.f32.mrf.mxu1 }
 0x48e   : > { %v2300_v13 = vadd.f32 %v4055_v37, %v2299_v59 }
 0x48f   : > { %v2459_v0 = vpop.f32.mrf.mxu2 }
 0x490   : > { %v2460_v40 = vadd.f32 %v4129_v32, %v2459_v0  ;;  %v2352_v20 = vmax.f32 %v2300_v13, 0.0 }
 0x492   : > { %v2539_v31 = vmax.f32 %v2460_v40, 0.0 }
 0x495   : > { %v2301_v45 = vpop.f32.mrf.mxu1 }
 0x496   : > { %v2302_v58 = vadd.f32 %v4055_v37, %v2301_v45 }
 0x497   : > { %v2461_v21 = vpop.f32.mrf.mxu2 }
 0x498   : > { %v2353_v16 = vmax.f32 %v2302_v58, 0.0  ;;  %v2462_v63 = vadd.f32 %v4129_v32, %v2461_v21 }
 0x49a   : > { %v2392_v15 = vpack.c.bf16 %v2353_v16, %v2352_v20  ;;  %v2540_v56 = vmax.f32 %v2462_v63, 0.0 }
 0x49c   : > { %2503 = vmatmul.bf16.gmra.mxu2 %v2392_v15  ;;  %v4135_v17 = vpack.c.bf16 %v2540_v56, %v2539_v31 }
 0x49d   : > { %v2304_v18 = vpop.f32.mrf.mxu1 }
 0x49e   : > { %v2305_v54 = vadd.f32 %v4055_v37, %v2304_v18 }
 0x49f   : > { %v2464_v12 = vpop.f32.mrf.mxu2 }
 0x4a0   : > { %v2465_v49 = vadd.f32 %v4129_v32, %v2464_v12  ;;  %v2354_v53 = vmax.f32 %v2305_v54, 0.0 }
 0x4a2   : > { %v2541_v14 = vmax.f32 %v2465_v49, 0.0 }
 0x4a5   : > { %v2306_v4 = vpop.f32.mrf.mxu1 }
 0x4a6   : > { %v2307_v22 = vadd.f32 %v4055_v37, %v2306_v4 }
 0x4a7   : > { %v2466_v11 = vpop.f32.mrf.mxu2 }
 0x4a8   : > { %v2355_v24 = vmax.f32 %v2307_v22, 0.0  ;;  %v2467_v6 = vadd.f32 %v4129_v32, %v2466_v11 }
 0x4aa   : > { %v2393_v7 = vpack.c.bf16 %v2355_v24, %v2354_v53  ;;  %v2542_v10 = vmax.f32 %v2467_v6, 0.0 }
 0x4ac   : > { %2508 = vmatmul.bf16.gmra.mxu2 %v2393_v7  ;;  %v4141_v44 = vpack.c.bf16 %v2542_v10, %v2541_v14 }
 0x4ad   : > { %v2309_v9 = vpop.f32.mrf.mxu1 }
 0x4ae   : > { %v2310_v34 = vadd.f32 %v4055_v37, %v2309_v9 }
 0x4af   : > { %v2469_v46 = vpop.f32.mrf.mxu2 }
 0x4b0   : > { %v2470_v61 = vadd.f32 %v4129_v32, %v2469_v46  ;;  %v2356_v39 = vmax.f32 %v2310_v34, 0.0 }
 0x4b2   : > { %v2543_v47 = vmax.f32 %v2470_v61, 0.0 }
 0x4b5   : > { %v2311_v30 = vpop.f32.mrf.mxu1 }
 0x4b6   : > { %v2312_v38 = vadd.f32 %v4055_v37, %v2311_v30 }
 0x4b7   : > { %v2471_v42 = vpop.f32.mrf.mxu2 }
 0x4b8   : > { %v2357_v19 = vmax.f32 %v2312_v38, 0.0  ;;  %v2472_v26 = vadd.f32 %v4129_v32, %v2471_v42 }
 0x4ba   : > { %v2394_v2 = vpack.c.bf16 %v2357_v19, %v2356_v39  ;;  %v2544_v36 = vmax.f32 %v2472_v26, 0.0 }
 0x4bc   : > { %2513 = vmatmul.bf16.gmra.mxu2 %v2394_v2  ;;  %v4147_v5 = vpack.c.bf16 %v2544_v36, %v2543_v47 }
 0x4bd   : > { %v2314_v41 = vpop.f32.mrf.mxu1 }
 0x4be   : > { %v2315_v50 = vadd.f32 %v4055_v37, %v2314_v41 }
 0x4bf   : > { %v2474_v55 = vpop.f32.mrf.mxu2 }
 0x4c0   : > { %v2475_v33 = vadd.f32 %v4129_v32, %v2474_v55  ;;  %v2358_v23 = vmax.f32 %v2315_v50, 0.0 }
 0x4c2   : > { %v2545_v51 = vmax.f32 %v2475_v33, 0.0 }
 0x4c5   : > { %v2316_v52 = vpop.f32.mrf.mxu1 }
 0x4c6   : > { %v2317_v1 = vadd.f32 %v4055_v37, %v2316_v52 }
 0x4c7   : > { %v2476_v3 = vpop.f32.mrf.mxu2 }
 0x4c8   : > { %v2359_v27 = vmax.f32 %v2317_v1, 0.0  ;;  %v2477_v28 = vadd.f32 %v4129_v32, %v2476_v3 }
 0x4ca   : > { %v2395_v48 = vpack.c.bf16 %v2359_v27, %v2358_v23  ;;  %v2546_v60 = vmax.f32 %v2477_v28, 0.0 }
 0x4cc   : > { %2518 = vmatmul.bf16.gmra.mxu2 %v2395_v48  ;;  %v4153_v43 = vpack.c.bf16 %v2546_v60, %v2545_v51 }
 0x4cd   : > { %v2319_v57 = vpop.f32.mrf.mxu1 }
 0x4ce   : > { %v2320_v29 = vadd.f32 %v4055_v37, %v2319_v57 }
 0x4cf   : > { %v2479_v62 = vpop.f32.mrf.mxu2 }
 0x4d0   : > { %v2480_v25 = vadd.f32 %v4129_v32, %v2479_v62  ;;  %v2360_v0 = vmax.f32 %v2320_v29, 0.0 }
 0x4d2   : > { %v2547_v40 = vmax.f32 %v2480_v25, 0.0 }
 0x4d5   : > { %v2321_v35 = vpop.f32.mrf.mxu1 }
 0x4d6   : > { %v2322_v8 = vadd.f32 %v4055_v37, %v2321_v35 }
 0x4d7   : > { %v2481_v59 = vpop.f32.mrf.mxu2 }
 0x4d8   : > { %v2361_v13 = vmax.f32 %v2322_v8, 0.0  ;;  %v2482_v45 = vadd.f32 %v4129_v32, %v2481_v59 }
 0x4da   : > { %v2396_v58 = vpack.c.bf16 %v2361_v13, %v2360_v0  ;;  %v2548_v21 = vmax.f32 %v2482_v45, 0.0 }
 0x4dc   : > { %v2576_v20 = vpack.c.bf16 %v2548_v21, %v2547_v40  ;;  %2523 = vmatmul.bf16.gmra.mxu2 %v2396_v58 }
 0x4dd   : > { %v2324_v16 = vpop.f32.mrf.mxu1 }
 0x4de   : > { %v2325_v31 = vadd.f32 %v4055_v37, %v2324_v16 }
 0x4df   : > { %v2484_v63 = vpop.f32.mrf.mxu2 }
 0x4e0   : > { %v2362_v12 = vmax.f32 %v2325_v31, 0.0  ;;  %v2485_v41 = vadd.f32 %v4129_v32, %v2484_v63 }
 0x4e2   : > { %v2549_v1 = vmax.f32 %v2485_v41, 0.0 }
 0x4e5   : > { %v2326_v15 = vpop.f32.mrf.mxu1 }
 0x4e6   : > { %v2327_v56 = vadd.f32 %v4055_v37, %v2326_v15 }
 0x4e7   : > { %v2486_v18 = vpop.f32.mrf.mxu2 }
 0x4e8   : > { %v2363_v54 = vmax.f32 %v2327_v56, 0.0  ;;  %v2487_v2 = vadd.f32 %v4129_v32, %v2486_v18 }
 0x4ea   : > { %v2397_v4 = vpack.c.bf16 %v2363_v54, %v2362_v12  ;;  %v2550_v52 = vmax.f32 %v2487_v2, 0.0  ;;  %v2588_v2 = vld [vmem:[#allocation2] sm:$0x1] }
 0x4ec   : > { %2528 = vmatmul.bf16.gmra.mxu2 %v2397_v4  ;;  %v2577_v27 = vpack.c.bf16 %v2550_v52, %v2549_v1 }
 0x4ed   : > { %v2329_v49 = vpop.f32.mrf.mxu1 }
 0x4ee   : > { %v2330_v11 = vadd.f32 %v4055_v37, %v2329_v49 }
 0x4ef   : > { %v2489_v22 = vpop.f32.mrf.mxu2 }
 0x4f0   : > { %v2364_v14 = vmax.f32 %v2330_v11, 0.0  ;;  %v2490_v19 = vadd.f32 %v4129_v32, %v2489_v22 }
 0x4f2   : > { %v2551_v47 = vmax.f32 %v2490_v19, 0.0 }
 0x4f5   : > { %v2331_v53 = vpop.f32.mrf.mxu1 }
 0x4f6   : > { %v2332_v24 = vadd.f32 %v4055_v37, %v2331_v53 }
 0x4f7   : > { %v2491_v6 = vpop.f32.mrf.mxu2 }
 0x4f8   : > { %v2365_v7 = vmax.f32 %v2332_v24, 0.0  ;;  %v2492_v42 = vadd.f32 %v4129_v32, %v2491_v6 }
 0x4fa   : > { %v2398_v10 = vpack.c.bf16 %v2365_v7, %v2364_v14  ;;  %v2552_v26 = vmax.f32 %v2492_v42, 0.0  ;;  %v2571_v42 = vld [vmem:[%s4240_s13] sm:$0x1] }
 0x4fc   : > { %2533 = vmatmul.bf16.gmra.mxu2 %v2398_v10  ;;  %v2578_v36 = vpack.c.bf16 %v2552_v26, %v2551_v47  ;;  %v3234_v47 = vmov 0  }
 0x4fd   : > { %3095 = vset.pattern.permute.xlu1 %v3234_v47  ;;  %3096 = vset.pattern.permute.xlu0 %v3234_v47 }
 0x4fe   : > { %2591 = vperm.xlu1 %3095, %v2588_v2  }
 0x4ff   : > { %v2494_v9 = vpop.f32.mrf.mxu2 }
 0x500   : > { %v2495_v46 = vadd.f32 %v4129_v32, %v2494_v9 }
 0x502   : > { %v2553_v61 = vmax.f32 %v2495_v46, 0.0 }
 0x507   : > { %v2496_v34 = vpop.f32.mrf.mxu2 }
 0x508   : > { %v2497_v30 = vadd.f32 %v4129_v32, %v2496_v34 }
 0x50a   : > { %v2554_v38 = vmax.f32 %v2497_v30, 0.0 }
 0x50c   : > { %v2579_v39 = vpack.c.bf16 %v2554_v38, %v2553_v61 }
 0x50e   : > { %2595 = vmatpush.bf16.xpose.msra.mxu3 %v2579_v39 }
 0x50f   : > { %v2499_v37 = vpop.f32.mrf.mxu2 }
 0x510   : > { %v2500_v55 = vadd.f32 %v4129_v32, %v2499_v37 }
 0x512   : > { %v2555_v3 = vmax.f32 %v2500_v55, 0.0 }
 0x516   : > { %2596 = vmatpush.bf16.xpose.msra.mxu3 %v2578_v36 }
 0x517   : > { %v2501_v50 = vpop.f32.mrf.mxu2 }
 0x518   : > { %v2502_v33 = vadd.f32 %v4129_v32, %v2501_v50  ;;  %v2627_v50 = vlaneseq }
 0x51a   : > { %v2556_v23 = vmax.f32 %v2502_v33, 0.0  ;;  %vm2629_vm2 = vcmp.lt.s32.totalorder %v2627_v50, 256 }
 0x51c   : > { %v4171_v28 = vpack.c.bf16 %v2556_v23, %v2555_v3 }
 0x51e   : > { %2597 = vmatpush.bf16.xpose.msra.mxu3 %v2577_v27 }
 0x51f   : > { %v2504_v51 = vpop.f32.mrf.mxu2 }
 0x520   : > { %v2505_v48 = vadd.f32 %v4129_v32, %v2504_v51 }
 0x522   : > { %v2557_v62 = vmax.f32 %v2505_v48, 0.0 }
 0x526   : > { %2598 = vmatpush.bf16.xpose.msra.mxu3 %v2576_v20 }
 0x527   : > { %v2506_v60 = vpop.f32.mrf.mxu2 }
 0x528   : > { %v2507_v57 = vadd.f32 %v4129_v32, %v2506_v60 }
 0x52a   : > { %v2558_v29 = vmax.f32 %v2507_v57, 0.0 }
 0x52c   : > { %v2581_v35 = vpack.c.bf16 %v2558_v29, %v2557_v62 }
 0x52e   : > { %2599 = vmatpush.bf16.xpose.msra.mxu3 %v4153_v43 }
 0x52f   : > { %v2509_v25 = vpop.f32.mrf.mxu2 }
 0x530   : > { %v2510_v8 = vadd.f32 %v4129_v32, %v2509_v25 }
 0x532   : > { %v2559_v13 = vmax.f32 %v2510_v8, 0.0 }
 0x536   : > { %2600 = vmatpush.bf16.xpose.msra.mxu3 %v4147_v5 }
 0x537   : > { %v2511_v59 = vpop.f32.mrf.mxu2 }
 0x538   : > { %v2512_v0 = vadd.f32 %v4129_v32, %v2511_v59 }
 0x53a   : > { %v2560_v45 = vmax.f32 %v2512_v0, 0.0 }
 0x53c   : > { %v2582_v40 = vpack.c.bf16 %v2560_v45, %v2559_v13 }
 0x53e   : > { %2601 = vmatpush.bf16.xpose.msra.mxu3 %v4141_v44 }
 0x53f   : > { %v2514_v58 = vpop.f32.mrf.mxu2 }
 0x540   : > { %v2515_v21 = vadd.f32 %v4129_v32, %v2514_v58 }
 0x542   : > { %v2561_v16 = vmax.f32 %v2515_v21, 0.0 }
 0x546   : > { %2602 = vmatpush.bf16.xpose.msra.mxu3 %v4135_v17 }
 0x547   : > { %v2516_v20 = vpop.f32.mrf.mxu2 }
 0x548   : > { %v2517_v43 = vadd.f32 %v4129_v32, %v2516_v20 }
 0x54a   : > { %v2562_v63 = vmax.f32 %v2517_v43, 0.0 }
 0x54c   : > { %v2583_v31 = vpack.c.bf16 %v2562_v63, %v2561_v16 }
 0x54d   : > { %2603 = vmatmul.bf16.vlgmr.msra.gmra.mxu3 %v2571_v42 }
 0x54f   : > { %v2519_v5 = vpop.f32.mrf.mxu2 }
 0x550   : > { %v2520_v15 = vadd.f32 %v4129_v32, %v2519_v5 }
 0x552   : > { %v2563_v12 = vmax.f32 %v2520_v15, 0.0 }
 0x557   : > { %v2521_v56 = vpop.f32.mrf.mxu2 }
 0x558   : > { %v2522_v18 = vadd.f32 %v4129_v32, %v2521_v56 }
 0x55a   : > { %v2564_v54 = vmax.f32 %v2522_v18, 0.0 }
 0x55c   : > { %v2584_v44 = vpack.c.bf16 %v2564_v54, %v2563_v12 }
 0x55f   : > { %v2524_v4 = vpop.f32.mrf.mxu2 }
 0x560   : > { %v2525_v39 = vadd.f32 %v4129_v32, %v2524_v4 }
 0x562   : > { %v2565_v37 = vmax.f32 %v2525_v39, 0.0 }
 0x567   : > { %v2526_v49 = vpop.f32.mrf.mxu2 }
 0x568   : > { %v2527_v61 = vadd.f32 %v4129_v32, %v2526_v49 }
 0x56a   : > { %v2566_v19 = vmax.f32 %v2527_v61, 0.0 }
 0x56c   : > { %v2585_v26 = vpack.c.bf16 %v2566_v19, %v2565_v37 }
 0x56f   : > { %v2529_v22 = vpop.f32.mrf.mxu2 }
 0x570   : > { %v2530_v46 = vadd.f32 %v4129_v32, %v2529_v22  ;;  %v2592_v41 = vpop.permute.xlu1 %2591 }
 0x571   : > { %v2594_v55 = vperm.slane %v2592_v41, 0 }
 0x572   : > { %v2567_v30 = vmax.f32 %v2530_v46, 0.0 }
 0x577   : > { %v2531_v11 = vpop.f32.mrf.mxu2 }
 0x578   : > { %v2532_v10 = vadd.f32 %v4129_v32, %v2531_v11 }
 0x57a   : > { %v2568_v34 = vmax.f32 %v2532_v10, 0.0 }
 0x57c   : > { %v2586_v38 = vpack.c.bf16 %v2568_v34, %v2567_v30 }
 0x57f   : > { %v2534_v17 = vpop.f32.mrf.mxu2 }
 0x580   : > { %v2535_v53 = vadd.f32 %v4129_v32, %v2534_v17 }
 0x582   : > { %v2569_v14 = vmax.f32 %v2535_v53, 0.0 }
 0x587   : > { %v2536_v24 = vpop.f32.mrf.mxu2 }
 0x588   : > { %v2537_v6 = vadd.f32 %v4129_v32, %v2536_v24 }
 0x58a   : > { %v2570_v7 = vmax.f32 %v2537_v6, 0.0 }
 0x58c   : > { %v2587_v9 = vpack.c.bf16 %v2570_v7, %v2569_v14 }
 0x58e   : > { %2608 = vmatpush.bf16.xpose.msrb.mxu3 %v2587_v9 }
 0x596   : > { %2609 = vmatpush.bf16.xpose.msrb.mxu3 %v2586_v38 }
 0x59e   : > { %2610 = vmatpush.bf16.xpose.msrb.mxu3 %v2585_v26 }
 0x5a6   : > { %2611 = vmatpush.bf16.xpose.msrb.mxu3 %v2584_v44 }
 0x5ae   : > { %2612 = vmatpush.bf16.xpose.msrb.mxu3 %v2583_v31 }
 0x5b6   : > { %2613 = vmatpush.bf16.xpose.msrb.mxu3 %v2582_v40 }
 0x5be   : > { %2614 = vmatpush.bf16.xpose.msrb.mxu3 %v2581_v35 }
 0x5c6   : > { %2615 = vmatpush.bf16.xpose.msrb.mxu3 %v4171_v28 }
 0x5cd   : > { %2616 = vmatmul.bf16.vlgmr.msrb.gmra.mxu3 %v2571_v42 }
 0x5d0   : > { %v2604_v32 = vpop.f32.mrf.mxu3 }
 0x5d1   : > { %v2605_v1 = vadd.f32 %v2604_v32, %v2594_v55 }
 0x5d8   : > { %v2606_v36 = vpop.f32.mrf.mxu3 }
 0x650   : > { %v2617_v52 = vpop.f32.mrf.mxu3 }
 0x651   : > { %v2618_v33 = vadd.f32 %v2617_v52, %v2594_v55 }
 0x653   : > { %v2623_v3 = vrot.slane %v2618_v33, 7 }
 0x655   : > { %v2625_v23 = vsel %vm2624_vm1, %v2605_v1, %v2623_v3 }
 0x656   : > { %2631 = vst.msk [vmem:[%s490_s16] sm:$0x3] %vm2629_vm2, %v2625_v23 }
 0x657   : > { %3196 = shalt.err (!%p3193_p3)
}
 0x658   : > { %3054 = dma.vmem_to_hbm [thread:$0]  (%p3356_p5), %s2646_s17, 32, %s2648_s25, %s2633_s14   ;;  %v2619_v27 = vpop.f32.mrf.mxu3 }
 0x659 PF: > { %p3060_p4 = scmp.ge.s32.totalorder %s3231_s23, 2  ;;  %s2659_s19 = sand.u32 1, %s3219_s20  }
 0x65a   : > { %s2660_s16 = scalar_lea.sflag [#allocation4], %s2659_s19 }
 0x65b   : > { %p3057_p7 = pnand %p3060_p4, %p3360_p6 }
 0x65d   : > { %p3058_p8 = pneg %p3057_p7 }
 0x65f   : > { %3214 = dma.done.wait (%p3058_p8), %s2660_s16, 32  }
 0x660   : > { %3216 = vsyncadd (%p3058_p8), %s2660_s16, 4294967264  ;;  %s4253_s23 = sld [smem:[#allocation7_spill]]  ;;  %s4256_s20 = smov %s3223_s21 }
 0x661   : > { %s4254_s0 = sld [smem:[#allocation6_spill]] }
 0x662   : > { %s4255_s22 = sld [smem:[#allocation8_spill]] }
 0x666   : > { %p27_p9 = scmp.ge.s32.totalorder %s4253_s23, 4  }
 0x667   : > { %s4257_s21 = smov %s4254_s0 }
 0x668   :  { %29 = sbr.rel (!%p27_p9) target bundleno = 6 (0x6), region = 115 }
 0x66d   :  { %2666 = vsyncpa [#allocation4], 1 }
 0x66e   :  { %2668 = vsyncpa [#allocation4 + $0x1], 1 }

</bundles_post_ra>
